<compile_context>
chip_gen: v7x
topology: tpu7x:2x2x1
jax: 0.10.0
libtpu: 0.0.40
codegen_flags: <defaults>
</compile_context>

<pallas_src>
import functools

import jax
import jax.numpy as jnp
from jax import lax
from jax.experimental import pallas as pl
from jax.experimental.pallas import tpu as pltpu


def _round_up(x, m):
    return ((x + m - 1) // m) * m


def mq_rnn_kernel(x_hist_ref, y_hist_ref, x_pred_ref,
                  w_enc_ref, b_enc_ref, w_enc_pred_ref, b_enc_pred_ref,
                  w_ih_x_ref, w_ih_y_ref, w_hh_ref, b_lstm_ref,
                  w_g_h_ref, w_g_x_ref, b_g_ref,
                  w_dec_ctx_ref, w_dec_x_ref, b_dec_ref,
                  out_ref,
                  gates_ref,
                  *, hidden_size, hist_long, tile_b, compute_dtype):
    H, T, TB = hidden_size, hist_long, tile_b
    f32 = jnp.float32
    cd = compute_dtype

    x_hist = x_hist_ref[0].astype(cd)          # (T*TB, D)   time-major
    y_hist = y_hist_ref[0]                     # (T*TB, 1)   f32
    x_pred = x_pred_ref[0].astype(cd)          # (TB, P*D)   batch-major flat

    # ---- hoisted: encoder over every history step in ONE matmul ----
    feat_hist = jnp.tanh(
        jnp.dot(x_hist, w_enc_ref[...].astype(cd), preferred_element_type=f32)
        + b_enc_ref[...])                                             # (T*TB, C)

    # ---- hoisted: full input-side LSTM gate contribution for all steps,
    #      gate columns pre-ordered [i, f, o, g]; spilled to VMEM scratch so
    #      the recurrence only touches one (TB, 4H) tile per step ----
    gates_ref[...] = (
        jnp.dot(feat_hist.astype(cd), w_ih_x_ref[...].astype(cd),
                preferred_element_type=f32)
        + y_hist * w_ih_y_ref[...]
        + b_lstm_ref[...])                                            # (T*TB, 4H)

    # ---- serial LSTM recurrence: only h @ W_hh + elementwise gates left ----
    w_hh = w_hh_ref[...].astype(cd)

    def lstm_step(t, carry):
        h, c = carry
        start = pl.multiple_of(t * TB, TB)
        g_in = gates_ref[pl.ds(start, TB), :]                         # (TB, 4H)
        gates = g_in + jnp.dot(h.astype(cd), w_hh,
                               preferred_element_type=f32)
        sig = jax.nn.sigmoid(gates[:, :3 * H])       # one EUP launch: i, f, o
        i_g = sig[:, 0:H]
        f_g = sig[:, H:2 * H]
        o_g = sig[:, 2 * H:3 * H]
        g_g = jnp.tanh(gates[:, 3 * H:4 * H])        # one EUP launch: g
        c = f_g * c + i_g * g_g
        h = o_g * jnp.tanh(c)
        return h, c

    h0 = jnp.zeros((TB, H), f32)
    c0 = jnp.zeros((TB, H), f32)
    h, _ = lax.fori_loop(0, T, lstm_step, (h0, c0), unroll=(T <= 16))

    # ---- encoder on pred-horizon covariates: one block-diag matmul that
    #      yields the decoder's flattened (TB, P*C) feature slab ----
    # TODO(synk): for long horizons replace the kron/block-diag weights with a
    # (TB*P, D)@(D, C) layout built in the wrapper (block-diag is O(P^2) FLOPs
    # and VMEM; fine at P=4).
    feat_pred = jnp.tanh(
        jnp.dot(x_pred, w_enc_pred_ref[...].astype(cd),
                preferred_element_type=f32)
        + b_enc_pred_ref[...])                                        # (TB, P*C)

    # ---- decoder global MLP: sigmoid(concat(h, x_future) @ W_g + b_g),
    #      fused as a split matmul: 2 MXU pushes (K=H, K=P*C) ----
    ctx = jax.nn.sigmoid(
        jnp.dot(h.astype(cd), w_g_h_ref[...].astype(cd),
                preferred_element_type=f32)
        + jnp.dot(feat_pred.astype(cd), w_g_x_ref[...].astype(cd),
                  preferred_element_type=f32)
        + b_g_ref[...])                                               # (TB, C*(P+1))

    # ---- decoder local MLP for ALL horizons: 2 matmuls against block-diag /
    #      lane-tiled weights whose columns were zero-padded to a multiple of
    #      128 in the wrapper => ONE lane-dense, unmasked output store ----
    out_pad = (jnp.dot(ctx.astype(cd), w_dec_ctx_ref[...].astype(cd),
                       preferred_element_type=f32)
               + jnp.dot(feat_pred.astype(cd), w_dec_x_ref[...].astype(cd),
                         preferred_element_type=f32)
               + b_dec_ref[...])                                      # (TB, OUT_PAD)
    out_ref[0] = out_pad.astype(out_ref.dtype)


def mq_rnn_forward(params, x_seq_hist, y_seq_hist, x_seq_pred, y_seq_pred,
                   *, hidden_size, context_size, pred_long, hist_long,
                   num_quantiles, tile_b=None, compute_dtype=jnp.float32):
    B, T, D = x_seq_hist.shape
    assert T == hist_long
    P, C, H, Q = pred_long, context_size, hidden_size, num_quantiles
    G = C * (P + 1)
    assert x_seq_pred.shape[1] == P and y_seq_pred.shape[1] == P

    f32 = jnp.float32
    sublane_mult = 16 if compute_dtype == jnp.bfloat16 else 8

    # ---- batch tiling: sublane-aligned TB; default = whole padded batch so
    #      nB == 1 on v5e/v6e (grid is a sequential loop there).  Supply an
    #      explicit tile_b to get >=2 parallel blocks on v7x (2 TCs).
    if tile_b is None:
        tile_b = min(_round_up(B, sublane_mult), 512)
    assert tile_b % sublane_mult == 0, "tile_b must be sublane-aligned"
    TB = tile_b
    padded_B = _round_up(B, TB)
    nB = padded_B // TB
    pad_rows = padded_B - B

    # ---- lane-dense output: pad the (P*Q) output columns up to 128 ----
    OUT_PAD = _round_up(P * Q, 128)

    # ---- batch padding (rows are dropped after the call) ----
    xh = jnp.pad(x_seq_hist.astype(f32), ((0, pad_rows), (0, 0), (0, 0)))
    yh = jnp.pad(y_seq_hist.astype(f32), ((0, pad_rows), (0, 0)))
    xp = jnp.pad(x_seq_pred.astype(f32), ((0, pad_rows), (0, 0), (0, 0)))

    # ---- data layout: time-major history per batch block (wrapper reshapes
    #      are free; the kernel only ever sees 2D lane/sublane-friendly slabs)
    x_hist = (xh.reshape(nB, TB, T, D).transpose(0, 2, 1, 3)
              .reshape(nB, T * TB, D))
    y_hist = (yh.reshape(nB, TB, T).transpose(0, 2, 1)
              .reshape(nB, T * TB, 1))
    x_pred = xp.reshape(nB, TB, P * D)

    # ---- weight repacking (host/XLA side) ----
    w_enc = params["w_enc"].astype(f32)                               # (D, C)
    b_enc = params["b_enc"].astype(f32).reshape(1, C)
    eye_p = jnp.eye(P, dtype=f32)
    w_enc_pred = jnp.kron(eye_p, w_enc)                               # (P*D, P*C)
    b_enc_pred = jnp.tile(b_enc, (1, P))                              # (1, P*C)

    # LSTM weights: reorder gate columns [i, f, g, o] -> [i, f, o, g] so the
    # kernel does a single sigmoid over the first 3H columns.
    def reorder_gates(w):
        return jnp.concatenate(
            [w[..., 0:2 * H], w[..., 3 * H:4 * H], w[..., 2 * H:3 * H]],
            axis=-1)

    w_ih = reorder_gates(params["w_ih"].astype(f32))                  # (C+1, 4H)
    w_ih_x = w_ih[:C, :]
    w_ih_y = w_ih[C:C + 1, :]
    w_hh = reorder_gates(params["w_hh"].astype(f32))                  # (H, 4H)
    b_lstm = reorder_gates(
        (params["b_ih"] + params["b_hh"]).astype(f32).reshape(1, 4 * H))

    w_g = params["w_g"].astype(f32)                                   # (H+P*C, G)
    w_g_h = w_g[:H, :]
    w_g_x = w_g[H:, :]
    b_g = params["b_g"].astype(f32).reshape(1, G)

    w_l = params["w_l"].astype(f32)                                   # (3C, Q)
    w_l_ck, w_l_ca, w_l_x = w_l[:C, :], w_l[C:2 * C, :], w_l[2 * C:, :]
    col_pad = OUT_PAD - P * Q
    w_dec_ctx = jnp.pad(
        jnp.concatenate([jnp.kron(eye_p, w_l_ck), jnp.tile(w_l_ca, (1, P))],
                        axis=0),
        ((0, 0), (0, col_pad)))                                       # (G, OUT_PAD)
    w_dec_x = jnp.pad(jnp.kron(eye_p, w_l_x), ((0, 0), (0, col_pad)))  # (P*C, OUT_PAD)
    b_dec = jnp.pad(jnp.tile(params["b_l"].astype(f32).reshape(1, Q), (1, P)),
                    ((0, 0), (0, col_pad)))                           # (1, OUT_PAD)

    inputs = (x_hist, y_hist, x_pred,
              w_enc, b_enc, w_enc_pred, b_enc_pred,
              w_ih_x, w_ih_y, w_hh, b_lstm,
              w_g_h, w_g_x, b_g,
              w_dec_ctx, w_dec_x, b_dec)

    def batched_spec(shape):
        return pl.BlockSpec((1,) + tuple(shape[1:]),
                            lambda i: (i,) + (0,) * (len(shape) - 1))

    def resident_spec(shape):
        # TODO(synk): on v7x, cap buffering of these constant-index weight
        # blocks (pipeline_mode) once kron-expanded weights grow large.
        return pl.BlockSpec(tuple(shape), lambda i: (0,) * len(shape))

    in_specs = [batched_spec(x_hist.shape), batched_spec(y_hist.shape),
                batched_spec(x_pred.shape)]
    in_specs += [resident_spec(a.shape) for a in inputs[3:]]
    out_spec = batched_spec((nB, TB, OUT_PAD))

    # ---- explicit VMEM budget (per-generation scoped defaults are far below
    #      physical; size the limit from the actual block/weight/scratch use)
    weight_bytes = sum(int(a.size) * a.dtype.itemsize for a in inputs[3:])
    block_bytes = (T * TB * D + T * TB + TB * P * D + TB * OUT_PAD) * 4
    scratch_bytes = T * TB * 4 * H * 4
    vmem_needed = 2 * block_bytes + 2 * weight_bytes + scratch_bytes
    vmem_limit = int(min(max(2 * vmem_needed + (8 << 20), 16 << 20), 56 << 20))

    # Advisory cost estimate (latency-bound custom call) for the XLA scheduler.
    flops = int(2 * padded_B * (T * D * C + T * C * 4 * H + T * H * 4 * H
                                + (P * D) * (P * C)
                                + (H + P * C) * G
                                + (G + P * C) * OUT_PAD))
    transcendentals = int(padded_B * (T * C + P * C + 5 * T * H + G))
    bytes_accessed = int(sum(int(a.size) * a.dtype.itemsize for a in inputs)
                         + padded_B * OUT_PAD * 4)

    kernel = functools.partial(
        mq_rnn_kernel, hidden_size=H, hist_long=T, tile_b=TB,
        compute_dtype=compute_dtype)

    out = pl.pallas_call(
        kernel,
        out_shape=jax.ShapeDtypeStruct((nB, TB, OUT_PAD), jnp.float32),
        grid=(nB,),
        in_specs=in_specs,
        out_specs=out_spec,
        scratch_shapes=[pltpu.VMEM((T * TB, 4 * H), jnp.float32)],
        compiler_params=pltpu.CompilerParams(
            dimension_semantics=("parallel",),
            vmem_limit_bytes=vmem_limit),
        cost_estimate=pl.CostEstimate(
            flops=flops, transcendentals=transcendentals,
            bytes_accessed=bytes_accessed),
    )(*inputs)

    result = out.reshape(padded_B, OUT_PAD)[:B, :P * Q].reshape(B, P, Q)
    # Module returns (result, y_seq_pred) — y_seq_pred is passed through untouched.
    return result, y_seq_pred


def init_params(key, input_dim, hidden_size, context_size, num_quantiles, pred_long):
    """Deterministic synthetic parameters matching the torch module's shapes."""
    H, C = hidden_size, context_size
    ks = jax.random.split(key, 8)
    return {
        # linear_encoder: Linear(input_dim, context_size), N(0, 0.02), bias 0
        "w_enc": 0.02 * jax.random.normal(ks[0], (input_dim, C), jnp.float32),
        "b_enc": jnp.zeros((1, C), jnp.float32),
        # lstm: LSTM(context_size+1, hidden_size), gates [i,f,g,o]
        "w_ih": 0.1 * jax.random.normal(ks[1], (C + 1, 4 * H), jnp.float32),
        "w_hh": 0.1 * jax.random.normal(ks[2], (H, 4 * H), jnp.float32),
        "b_ih": 0.1 * jax.random.normal(ks[3], (1, 4 * H), jnp.float32),
        "b_hh": 0.1 * jax.random.normal(ks[4], (1, 4 * H), jnp.float32),
        # decoder.global_mlp: Linear(H + C*pred_long, C*(pred_long+1))
        "w_g": 0.02 * jax.random.normal(
            ks[5], (H + C * pred_long, C * (pred_long + 1)), jnp.float32),
        "b_g": jnp.zeros((1, C * (pred_long + 1)), jnp.float32),
        # decoder.local_mlp: Linear(C*2 + C, num_quantiles)  (x_dim == context_size)
        "w_l": 0.02 * jax.random.normal(ks[6], (3 * C, num_quantiles), jnp.float32),
        "b_l": jnp.zeros((1, num_quantiles), jnp.float32),
    }


def mq_rnn_reference(params, x_hist, y_hist, x_pred, *, hidden_size,
                     context_size, pred_long):
    """Pure-JAX re-implementation of the torch forward (for correctness check)."""
    H, C = hidden_size, context_size
    feat_hist = jnp.tanh(x_hist @ params["w_enc"] + params["b_enc"][0])
    feat_pred = jnp.tanh(x_pred @ params["w_enc"] + params["b_enc"][0])
    x_total_hist = jnp.concatenate([feat_hist, y_hist[:, :, None]], axis=2)
    B, T, _ = x_total_hist.shape
    h = jnp.zeros((B, H), jnp.float32)
    c = jnp.zeros((B, H), jnp.float32)
    b = params["b_ih"][0] + params["b_hh"][0]
    for t in range(T):
        gates = x_total_hist[:, t, :] @ params["w_ih"] + h @ params["w_hh"] + b
        i = jax.nn.sigmoid(gates[:, :H])
        f = jax.nn.sigmoid(gates[:, H:2 * H])
        g = jnp.tanh(gates[:, 2 * H:3 * H])
        o = jax.nn.sigmoid(gates[:, 3 * H:])
        c = f * c + i * g
        h = o * jnp.tanh(c)
    xf = feat_pred.reshape(B, pred_long * C)
    ctx = jax.nn.sigmoid(
        jnp.concatenate([h, xf], axis=1) @ params["w_g"] + params["b_g"][0])
    ca = ctx[:, C * pred_long:]
    outs = []
    for k in range(pred_long):
        cak = jnp.concatenate(
            [ctx[:, k * C:(k + 1) * C], ca, feat_pred[:, k, :]], axis=1)
        outs.append(cak @ params["w_l"] + params["b_l"][0])
    return jnp.stack(outs, axis=1)


if __name__ == "__main__":
    input_dim = 4
    hidden_size = 32
    context_size = 8
    num_quantiles = 3
    pred_long = 4
    hist_long = 8
    batch = 2

    key = jax.random.PRNGKey(0)
    kp, k1, k2, k3, k4 = jax.random.split(key, 5)
    params = init_params(kp, input_dim, hidden_size, context_size,
                         num_quantiles, pred_long)

    x_seq_hist = jax.random.normal(k1, (batch, hist_long, input_dim), jnp.float32)
    y_seq_hist = jax.random.normal(k2, (batch, hist_long), jnp.float32)
    x_seq_pred = jax.random.normal(k3, (batch, pred_long, input_dim), jnp.float32)
    y_seq_pred = jax.random.normal(k4, (batch, pred_long), jnp.float32)

    result, y_out = mq_rnn_forward(
        params, x_seq_hist, y_seq_hist, x_seq_pred, y_seq_pred,
        hidden_size=hidden_size, context_size=context_size,
        pred_long=pred_long, hist_long=hist_long, num_quantiles=num_quantiles)
    result = jax.block_until_ready(result)

    assert result.shape == (batch, pred_long, num_quantiles)
    assert y_out.shape == y_seq_pred.shape

    ref = mq_rnn_reference(params, x_seq_hist, y_seq_hist, x_seq_pred,
                           hidden_size=hidden_size, context_size=context_size,
                           pred_long=pred_long)
    assert jnp.allclose(result, ref, atol=1e-4, rtol=1e-4), (
        f"max abs diff {jnp.max(jnp.abs(result - ref))}")

    print("KERNEL_OK")
</pallas_src>

<mosaic_0001>
module attributes {stable_mosaic.version = 11 : i64} {
  func.func @mq_rnn_kernel(%arg0: i32, %arg1: memref<1x64x4xf32, #tpu.memory_space<vmem>>, %arg2: memref<1x64x1xf32, #tpu.memory_space<vmem>>, %arg3: memref<1x8x16xf32, #tpu.memory_space<vmem>>, %arg4: memref<4x8xf32, #tpu.memory_space<vmem>>, %arg5: memref<1x8xf32, #tpu.memory_space<vmem>>, %arg6: memref<16x32xf32, #tpu.memory_space<vmem>>, %arg7: memref<1x32xf32, #tpu.memory_space<vmem>>, %arg8: memref<8x128xf32, #tpu.memory_space<vmem>>, %arg9: memref<1x128xf32, #tpu.memory_space<vmem>>, %arg10: memref<32x128xf32, #tpu.memory_space<vmem>>, %arg11: memref<1x128xf32, #tpu.memory_space<vmem>>, %arg12: memref<32x40xf32, #tpu.memory_space<vmem>>, %arg13: memref<32x40xf32, #tpu.memory_space<vmem>>, %arg14: memref<1x40xf32, #tpu.memory_space<vmem>>, %arg15: memref<40x128xf32, #tpu.memory_space<vmem>>, %arg16: memref<32x128xf32, #tpu.memory_space<vmem>>, %arg17: memref<1x128xf32, #tpu.memory_space<vmem>>, %arg18: memref<1x8x128xf32, #tpu.memory_space<vmem>>, %arg19: memref<64x128xf32, #tpu.memory_space<vmem>>) attributes {dimension_semantics = [#tpu.dimension_semantics<parallel>], iteration_bounds = array<i64: 1>, scalar_prefetch = 0 : i64, scratch_operands = 1 : i64, tpu.core_type = #tpu.core_type<tc>, window_params = [{transform_indices = @transform_0, window_bounds = array<i64: 1, 64, 4>}, {transform_indices = @transform_1, window_bounds = array<i64: 1, 64, 1>}, {transform_indices = @transform_2, window_bounds = array<i64: 1, 8, 16>}, {pipeline_mode = #tpu.pipeline_mode<synchronous>, transform_indices = @transform_3, window_bounds = array<i64: 4, 8>}, {pipeline_mode = #tpu.pipeline_mode<synchronous>, transform_indices = @transform_4, window_bounds = array<i64: 1, 8>}, {pipeline_mode = #tpu.pipeline_mode<synchronous>, transform_indices = @transform_5, window_bounds = array<i64: 16, 32>}, {pipeline_mode = #tpu.pipeline_mode<synchronous>, transform_indices = @transform_6, window_bounds = array<i64: 1, 32>}, {pipeline_mode = #tpu.pipeline_mode<synchronous>, transform_indices = @transform_7, window_bounds = array<i64: 8, 128>}, {pipeline_mode = #tpu.pipeline_mode<synchronous>, transform_indices = @transform_8, window_bounds = array<i64: 1, 128>}, {pipeline_mode = #tpu.pipeline_mode<synchronous>, transform_indices = @transform_9, window_bounds = array<i64: 32, 128>}, {pipeline_mode = #tpu.pipeline_mode<synchronous>, transform_indices = @transform_10, window_bounds = array<i64: 1, 128>}, {pipeline_mode = #tpu.pipeline_mode<synchronous>, transform_indices = @transform_11, window_bounds = array<i64: 32, 40>}, {pipeline_mode = #tpu.pipeline_mode<synchronous>, transform_indices = @transform_12, window_bounds = array<i64: 32, 40>}, {pipeline_mode = #tpu.pipeline_mode<synchronous>, transform_indices = @transform_13, window_bounds = array<i64: 1, 40>}, {pipeline_mode = #tpu.pipeline_mode<synchronous>, transform_indices = @transform_14, window_bounds = array<i64: 40, 128>}, {pipeline_mode = #tpu.pipeline_mode<synchronous>, transform_indices = @transform_15, window_bounds = array<i64: 32, 128>}, {pipeline_mode = #tpu.pipeline_mode<synchronous>, transform_indices = @transform_16, window_bounds = array<i64: 1, 128>}, {transform_indices = @transform_17, window_bounds = array<i64: 1, 8, 128>}]} {
    %c0 = arith.constant 0 : index
    %c0_0 = arith.constant 0 : index
    %c0_1 = arith.constant 0 : index
    %0 = vector.load %arg1[%c0, %c0_0, %c0_1] : memref<1x64x4xf32, #tpu.memory_space<vmem>>, vector<1x64x4xf32>
    %1 = vector.shape_cast %0 : vector<1x64x4xf32> to vector<64x4xf32>
    %c0_2 = arith.constant 0 : index
    %c0_3 = arith.constant 0 : index
    %c0_4 = arith.constant 0 : index
    %2 = vector.load %arg2[%c0_2, %c0_3, %c0_4] : memref<1x64x1xf32, #tpu.memory_space<vmem>>, vector<1x64x1xf32>
    %3 = vector.shape_cast %2 : vector<1x64x1xf32> to vector<64x1xf32>
    %c0_5 = arith.constant 0 : index
    %c0_6 = arith.constant 0 : index
    %c0_7 = arith.constant 0 : index
    %4 = vector.load %arg3[%c0_5, %c0_6, %c0_7] : memref<1x8x16xf32, #tpu.memory_space<vmem>>, vector<1x8x16xf32>
    %5 = vector.shape_cast %4 : vector<1x8x16xf32> to vector<8x16xf32>
    %c0_8 = arith.constant 0 : index
    %c0_9 = arith.constant 0 : index
    %6 = vector.load %arg4[%c0_8, %c0_9] : memref<4x8xf32, #tpu.memory_space<vmem>>, vector<4x8xf32>
    %cst = arith.constant dense<0.000000e+00> : vector<64x8xf32>
    %7 = tpu.matmul %1, %6, %cst {dimension_numbers = #tpu.dot_dimension_numbers<[1], [0], [0], [1], [0, 0, 1, 1], [], []>} : vector<64x4xf32>, vector<4x8xf32>, vector<64x8xf32> -> vector<64x8xf32>
    %c0_10 = arith.constant 0 : index
    %c0_11 = arith.constant 0 : index
    %8 = vector.load %arg5[%c0_10, %c0_11] : memref<1x8xf32, #tpu.memory_space<vmem>>, vector<1x8xf32>
    %9 = vector.broadcast %8 : vector<1x8xf32> to vector<64x8xf32>
    %10 = arith.addf %7, %9 : vector<64x8xf32>
    %11 = math.tanh %10 : vector<64x8xf32>
    %c0_12 = arith.constant 0 : index
    %c0_13 = arith.constant 0 : index
    %12 = vector.load %arg8[%c0_12, %c0_13] : memref<8x128xf32, #tpu.memory_space<vmem>>, vector<8x128xf32>
    %cst_14 = arith.constant dense<0.000000e+00> : vector<64x128xf32>
    %13 = tpu.matmul %11, %12, %cst_14 {dimension_numbers = #tpu.dot_dimension_numbers<[1], [0], [0], [1], [0, 0, 1, 1], [], []>} : vector<64x8xf32>, vector<8x128xf32>, vector<64x128xf32> -> vector<64x128xf32>
    %c0_15 = arith.constant 0 : index
    %c0_16 = arith.constant 0 : index
    %14 = vector.load %arg9[%c0_15, %c0_16] : memref<1x128xf32, #tpu.memory_space<vmem>>, vector<1x128xf32>
    %15 = vector.broadcast %3 : vector<64x1xf32> to vector<64x128xf32>
    %16 = vector.broadcast %14 : vector<1x128xf32> to vector<64x128xf32>
    %17 = arith.mulf %15, %16 : vector<64x128xf32>
    %18 = arith.addf %13, %17 : vector<64x128xf32>
    %c0_17 = arith.constant 0 : index
    %c0_18 = arith.constant 0 : index
    %19 = vector.load %arg11[%c0_17, %c0_18] : memref<1x128xf32, #tpu.memory_space<vmem>>, vector<1x128xf32>
    %20 = vector.broadcast %19 : vector<1x128xf32> to vector<64x128xf32>
    %21 = arith.addf %18, %20 : vector<64x128xf32>
    %c0_19 = arith.constant 0 : index
    %c0_20 = arith.constant 0 : index
    %22 = vector.load %arg19[%c0_19, %c0_20] : memref<64x128xf32, #tpu.memory_space<vmem>>, vector<64x128xf32>
    tpu.vector_store %arg19[%c0_19, %c0_20], %21 {strides = array<i32>} : memref<64x128xf32, #tpu.memory_space<vmem>>, vector<64x128xf32>,
    %c0_21 = arith.constant 0 : index
    %c0_22 = arith.constant 0 : index
    %23 = vector.load %arg10[%c0_21, %c0_22] : memref<32x128xf32, #tpu.memory_space<vmem>>, vector<32x128xf32>
    %cst_23 = arith.constant 0.000000e+00 : f32
    %24 = vector.broadcast %cst_23 : f32 to vector<8x32xf32>
    %cst_24 = arith.constant 0.000000e+00 : f32
    %25 = vector.broadcast %cst_24 : f32 to vector<8x32xf32>
    %c0_i32 = arith.constant 0 : i32
    %c8_i32 = arith.constant 8 : i32
    %26 = arith.muli %c0_i32, %c8_i32 : i32
    %27 = tpu.assume_multiple %26, 8 : i32
    %28 = arith.index_cast %27 : i32 to index
    %c0_25 = arith.constant 0 : index
    %29 = vector.load %arg19[%28, %c0_25] : memref<64x128xf32, #tpu.memory_space<vmem>>, vector<8x128xf32>
    %cst_26 = arith.constant dense<0.000000e+00> : vector<8x128xf32>
    %30 = tpu.matmul %24, %23, %cst_26 {dimension_numbers = #tpu.dot_dimension_numbers<[1], [0], [0], [1], [0, 0, 1, 1], [], []>} : vector<8x32xf32>, vector<32x128xf32>, vector<8x128xf32> -> vector<8x128xf32>
    %31 = arith.addf %29, %30 : vector<8x128xf32>
    %32 = vector.extract_strided_slice %31 {offsets = [0, 0], sizes = [8, 96], strides = [1, 1]} : vector<8x128xf32> to vector<8x96xf32>
    %33 = arith.negf %32 : vector<8x96xf32>
    %34 = math.exp %33 : vector<8x96xf32>
    %cst_27 = arith.constant 1.000000e+00 : f32
    %35 = vector.broadcast %cst_27 : f32 to vector<8x96xf32>
    %36 = arith.addf %35, %34 : vector<8x96xf32>
    %37 = arith.divf %35, %36 : vector<8x96xf32>
    %38 = vector.extract_strided_slice %37 {offsets = [0, 0], sizes = [8, 32], strides = [1, 1]} : vector<8x96xf32> to vector<8x32xf32>
    %39 = vector.extract_strided_slice %37 {offsets = [0, 32], sizes = [8, 32], strides = [1, 1]} : vector<8x96xf32> to vector<8x32xf32>
    %40 = vector.extract_strided_slice %37 {offsets = [0, 64], sizes = [8, 32], strides = [1, 1]} : vector<8x96xf32> to vector<8x32xf32>
    %41 = vector.extract_strided_slice %31 {offsets = [0, 96], sizes = [8, 32], strides = [1, 1]} : vector<8x128xf32> to vector<8x32xf32>
    %42 = math.tanh %41 : vector<8x32xf32>
    %43 = arith.mulf %39, %25 : vector<8x32xf32>
    %44 = arith.mulf %38, %42 : vector<8x32xf32>
    %45 = arith.addf %43, %44 : vector<8x32xf32>
    %46 = math.tanh %45 : vector<8x32xf32>
    %47 = arith.mulf %40, %46 : vector<8x32xf32>
    %c1_i32 = arith.constant 1 : i32
    %c8_i32_28 = arith.constant 8 : i32
    %48 = arith.muli %c1_i32, %c8_i32_28 : i32
    %49 = tpu.assume_multiple %48, 8 : i32
    %50 = arith.index_cast %49 : i32 to index
    %c0_29 = arith.constant 0 : index
    %51 = vector.load %arg19[%50, %c0_29] : memref<64x128xf32, #tpu.memory_space<vmem>>, vector<8x128xf32>
    %cst_30 = arith.constant dense<0.000000e+00> : vector<8x128xf32>
    %52 = tpu.matmul %47, %23, %cst_30 {dimension_numbers = #tpu.dot_dimension_numbers<[1], [0], [0], [1], [0, 0, 1, 1], [], []>} : vector<8x32xf32>, vector<32x128xf32>, vector<8x128xf32> -> vector<8x128xf32>
    %53 = arith.addf %51, %52 : vector<8x128xf32>
    %54 = vector.extract_strided_slice %53 {offsets = [0, 0], sizes = [8, 96], strides = [1, 1]} : vector<8x128xf32> to vector<8x96xf32>
    %55 = arith.negf %54 : vector<8x96xf32>
    %56 = math.exp %55 : vector<8x96xf32>
    %cst_31 = arith.constant 1.000000e+00 : f32
    %57 = vector.broadcast %cst_31 : f32 to vector<8x96xf32>
    %58 = arith.addf %57, %56 : vector<8x96xf32>
    %59 = arith.divf %57, %58 : vector<8x96xf32>
    %60 = vector.extract_strided_slice %59 {offsets = [0, 0], sizes = [8, 32], strides = [1, 1]} : vector<8x96xf32> to vector<8x32xf32>
    %61 = vector.extract_strided_slice %59 {offsets = [0, 32], sizes = [8, 32], strides = [1, 1]} : vector<8x96xf32> to vector<8x32xf32>
    %62 = vector.extract_strided_slice %59 {offsets = [0, 64], sizes = [8, 32], strides = [1, 1]} : vector<8x96xf32> to vector<8x32xf32>
    %63 = vector.extract_strided_slice %53 {offsets = [0, 96], sizes = [8, 32], strides = [1, 1]} : vector<8x128xf32> to vector<8x32xf32>
    %64 = math.tanh %63 : vector<8x32xf32>
    %65 = arith.mulf %61, %45 : vector<8x32xf32>
    %66 = arith.mulf %60, %64 : vector<8x32xf32>
    %67 = arith.addf %65, %66 : vector<8x32xf32>
    %68 = math.tanh %67 : vector<8x32xf32>
    %69 = arith.mulf %62, %68 : vector<8x32xf32>
    %c2_i32 = arith.constant 2 : i32
    %c8_i32_32 = arith.constant 8 : i32
    %70 = arith.muli %c2_i32, %c8_i32_32 : i32
    %71 = tpu.assume_multiple %70, 8 : i32
    %72 = arith.index_cast %71 : i32 to index
    %c0_33 = arith.constant 0 : index
    %73 = vector.load %arg19[%72, %c0_33] : memref<64x128xf32, #tpu.memory_space<vmem>>, vector<8x128xf32>
    %cst_34 = arith.constant dense<0.000000e+00> : vector<8x128xf32>
    %74 = tpu.matmul %69, %23, %cst_34 {dimension_numbers = #tpu.dot_dimension_numbers<[1], [0], [0], [1], [0, 0, 1, 1], [], []>} : vector<8x32xf32>, vector<32x128xf32>, vector<8x128xf32> -> vector<8x128xf32>
    %75 = arith.addf %73, %74 : vector<8x128xf32>
    %76 = vector.extract_strided_slice %75 {offsets = [0, 0], sizes = [8, 96], strides = [1, 1]} : vector<8x128xf32> to vector<8x96xf32>
    %77 = arith.negf %76 : vector<8x96xf32>
    %78 = math.exp %77 : vector<8x96xf32>
    %cst_35 = arith.constant 1.000000e+00 : f32
    %79 = vector.broadcast %cst_35 : f32 to vector<8x96xf32>
    %80 = arith.addf %79, %78 : vector<8x96xf32>
    %81 = arith.divf %79, %80 : vector<8x96xf32>
    %82 = vector.extract_strided_slice %81 {offsets = [0, 0], sizes = [8, 32], strides = [1, 1]} : vector<8x96xf32> to vector<8x32xf32>
    %83 = vector.extract_strided_slice %81 {offsets = [0, 32], sizes = [8, 32], strides = [1, 1]} : vector<8x96xf32> to vector<8x32xf32>
    %84 = vector.extract_strided_slice %81 {offsets = [0, 64], sizes = [8, 32], strides = [1, 1]} : vector<8x96xf32> to vector<8x32xf32>
    %85 = vector.extract_strided_slice %75 {offsets = [0, 96], sizes = [8, 32], strides = [1, 1]} : vector<8x128xf32> to vector<8x32xf32>
    %86 = math.tanh %85 : vector<8x32xf32>
    %87 = arith.mulf %83, %67 : vector<8x32xf32>
    %88 = arith.mulf %82, %86 : vector<8x32xf32>
    %89 = arith.addf %87, %88 : vector<8x32xf32>
    %90 = math.tanh %89 : vector<8x32xf32>
    %91 = arith.mulf %84, %90 : vector<8x32xf32>
    %c3_i32 = arith.constant 3 : i32
    %c8_i32_36 = arith.constant 8 : i32
    %92 = arith.muli %c3_i32, %c8_i32_36 : i32
    %93 = tpu.assume_multiple %92, 8 : i32
    %94 = arith.index_cast %93 : i32 to index
    %c0_37 = arith.constant 0 : index
    %95 = vector.load %arg19[%94, %c0_37] : memref<64x128xf32, #tpu.memory_space<vmem>>, vector<8x128xf32>
    %cst_38 = arith.constant dense<0.000000e+00> : vector<8x128xf32>
    %96 = tpu.matmul %91, %23, %cst_38 {dimension_numbers = #tpu.dot_dimension_numbers<[1], [0], [0], [1], [0, 0, 1, 1], [], []>} : vector<8x32xf32>, vector<32x128xf32>, vector<8x128xf32> -> vector<8x128xf32>
    %97 = arith.addf %95, %96 : vector<8x128xf32>
    %98 = vector.extract_strided_slice %97 {offsets = [0, 0], sizes = [8, 96], strides = [1, 1]} : vector<8x128xf32> to vector<8x96xf32>
    %99 = arith.negf %98 : vector<8x96xf32>
    %100 = math.exp %99 : vector<8x96xf32>
    %cst_39 = arith.constant 1.000000e+00 : f32
    %101 = vector.broadcast %cst_39 : f32 to vector<8x96xf32>
    %102 = arith.addf %101, %100 : vector<8x96xf32>
    %103 = arith.divf %101, %102 : vector<8x96xf32>
    %104 = vector.extract_strided_slice %103 {offsets = [0, 0], sizes = [8, 32], strides = [1, 1]} : vector<8x96xf32> to vector<8x32xf32>
    %105 = vector.extract_strided_slice %103 {offsets = [0, 32], sizes = [8, 32], strides = [1, 1]} : vector<8x96xf32> to vector<8x32xf32>
    %106 = vector.extract_strided_slice %103 {offsets = [0, 64], sizes = [8, 32], strides = [1, 1]} : vector<8x96xf32> to vector<8x32xf32>
    %107 = vector.extract_strided_slice %97 {offsets = [0, 96], sizes = [8, 32], strides = [1, 1]} : vector<8x128xf32> to vector<8x32xf32>
    %108 = math.tanh %107 : vector<8x32xf32>
    %109 = arith.mulf %105, %89 : vector<8x32xf32>
    %110 = arith.mulf %104, %108 : vector<8x32xf32>
    %111 = arith.addf %109, %110 : vector<8x32xf32>
    %112 = math.tanh %111 : vector<8x32xf32>
    %113 = arith.mulf %106, %112 : vector<8x32xf32>
    %c4_i32 = arith.constant 4 : i32
    %c8_i32_40 = arith.constant 8 : i32
    %114 = arith.muli %c4_i32, %c8_i32_40 : i32
    %115 = tpu.assume_multiple %114, 8 : i32
    %116 = arith.index_cast %115 : i32 to index
    %c0_41 = arith.constant 0 : index
    %117 = vector.load %arg19[%116, %c0_41] : memref<64x128xf32, #tpu.memory_space<vmem>>, vector<8x128xf32>
    %cst_42 = arith.constant dense<0.000000e+00> : vector<8x128xf32>
    %118 = tpu.matmul %113, %23, %cst_42 {dimension_numbers = #tpu.dot_dimension_numbers<[1], [0], [0], [1], [0, 0, 1, 1], [], []>} : vector<8x32xf32>, vector<32x128xf32>, vector<8x128xf32> -> vector<8x128xf32>
    %119 = arith.addf %117, %118 : vector<8x128xf32>
    %120 = vector.extract_strided_slice %119 {offsets = [0, 0], sizes = [8, 96], strides = [1, 1]} : vector<8x128xf32> to vector<8x96xf32>
    %121 = arith.negf %120 : vector<8x96xf32>
    %122 = math.exp %121 : vector<8x96xf32>
    %cst_43 = arith.constant 1.000000e+00 : f32
    %123 = vector.broadcast %cst_43 : f32 to vector<8x96xf32>
    %124 = arith.addf %123, %122 : vector<8x96xf32>
    %125 = arith.divf %123, %124 : vector<8x96xf32>
    %126 = vector.extract_strided_slice %125 {offsets = [0, 0], sizes = [8, 32], strides = [1, 1]} : vector<8x96xf32> to vector<8x32xf32>
    %127 = vector.extract_strided_slice %125 {offsets = [0, 32], sizes = [8, 32], strides = [1, 1]} : vector<8x96xf32> to vector<8x32xf32>
    %128 = vector.extract_strided_slice %125 {offsets = [0, 64], sizes = [8, 32], strides = [1, 1]} : vector<8x96xf32> to vector<8x32xf32>
    %129 = vector.extract_strided_slice %119 {offsets = [0, 96], sizes = [8, 32], strides = [1, 1]} : vector<8x128xf32> to vector<8x32xf32>
    %130 = math.tanh %129 : vector<8x32xf32>
    %131 = arith.mulf %127, %111 : vector<8x32xf32>
    %132 = arith.mulf %126, %130 : vector<8x32xf32>
    %133 = arith.addf %131, %132 : vector<8x32xf32>
    %134 = math.tanh %133 : vector<8x32xf32>
    %135 = arith.mulf %128, %134 : vector<8x32xf32>
    %c5_i32 = arith.constant 5 : i32
    %c8_i32_44 = arith.constant 8 : i32
    %136 = arith.muli %c5_i32, %c8_i32_44 : i32
    %137 = tpu.assume_multiple %136, 8 : i32
    %138 = arith.index_cast %137 : i32 to index
    %c0_45 = arith.constant 0 : index
    %139 = vector.load %arg19[%138, %c0_45] : memref<64x128xf32, #tpu.memory_space<vmem>>, vector<8x128xf32>
    %cst_46 = arith.constant dense<0.000000e+00> : vector<8x128xf32>
    %140 = tpu.matmul %135, %23, %cst_46 {dimension_numbers = #tpu.dot_dimension_numbers<[1], [0], [0], [1], [0, 0, 1, 1], [], []>} : vector<8x32xf32>, vector<32x128xf32>, vector<8x128xf32> -> vector<8x128xf32>
    %141 = arith.addf %139, %140 : vector<8x128xf32>
    %142 = vector.extract_strided_slice %141 {offsets = [0, 0], sizes = [8, 96], strides = [1, 1]} : vector<8x128xf32> to vector<8x96xf32>
    %143 = arith.negf %142 : vector<8x96xf32>
    %144 = math.exp %143 : vector<8x96xf32>
    %cst_47 = arith.constant 1.000000e+00 : f32
    %145 = vector.broadcast %cst_47 : f32 to vector<8x96xf32>
    %146 = arith.addf %145, %144 : vector<8x96xf32>
    %147 = arith.divf %145, %146 : vector<8x96xf32>
    %148 = vector.extract_strided_slice %147 {offsets = [0, 0], sizes = [8, 32], strides = [1, 1]} : vector<8x96xf32> to vector<8x32xf32>
    %149 = vector.extract_strided_slice %147 {offsets = [0, 32], sizes = [8, 32], strides = [1, 1]} : vector<8x96xf32> to vector<8x32xf32>
    %150 = vector.extract_strided_slice %147 {offsets = [0, 64], sizes = [8, 32], strides = [1, 1]} : vector<8x96xf32> to vector<8x32xf32>
    %151 = vector.extract_strided_slice %141 {offsets = [0, 96], sizes = [8, 32], strides = [1, 1]} : vector<8x128xf32> to vector<8x32xf32>
    %152 = math.tanh %151 : vector<8x32xf32>
    %153 = arith.mulf %149, %133 : vector<8x32xf32>
    %154 = arith.mulf %148, %152 : vector<8x32xf32>
    %155 = arith.addf %153, %154 : vector<8x32xf32>
    %156 = math.tanh %155 : vector<8x32xf32>
    %157 = arith.mulf %150, %156 : vector<8x32xf32>
    %c6_i32 = arith.constant 6 : i32
    %c8_i32_48 = arith.constant 8 : i32
    %158 = arith.muli %c6_i32, %c8_i32_48 : i32
    %159 = tpu.assume_multiple %158, 8 : i32
    %160 = arith.index_cast %159 : i32 to index
    %c0_49 = arith.constant 0 : index
    %161 = vector.load %arg19[%160, %c0_49] : memref<64x128xf32, #tpu.memory_space<vmem>>, vector<8x128xf32>
    %cst_50 = arith.constant dense<0.000000e+00> : vector<8x128xf32>
    %162 = tpu.matmul %157, %23, %cst_50 {dimension_numbers = #tpu.dot_dimension_numbers<[1], [0], [0], [1], [0, 0, 1, 1], [], []>} : vector<8x32xf32>, vector<32x128xf32>, vector<8x128xf32> -> vector<8x128xf32>
    %163 = arith.addf %161, %162 : vector<8x128xf32>
    %164 = vector.extract_strided_slice %163 {offsets = [0, 0], sizes = [8, 96], strides = [1, 1]} : vector<8x128xf32> to vector<8x96xf32>
    %165 = arith.negf %164 : vector<8x96xf32>
    %166 = math.exp %165 : vector<8x96xf32>
    %cst_51 = arith.constant 1.000000e+00 : f32
    %167 = vector.broadcast %cst_51 : f32 to vector<8x96xf32>
    %168 = arith.addf %167, %166 : vector<8x96xf32>
    %169 = arith.divf %167, %168 : vector<8x96xf32>
    %170 = vector.extract_strided_slice %169 {offsets = [0, 0], sizes = [8, 32], strides = [1, 1]} : vector<8x96xf32> to vector<8x32xf32>
    %171 = vector.extract_strided_slice %169 {offsets = [0, 32], sizes = [8, 32], strides = [1, 1]} : vector<8x96xf32> to vector<8x32xf32>
    %172 = vector.extract_strided_slice %169 {offsets = [0, 64], sizes = [8, 32], strides = [1, 1]} : vector<8x96xf32> to vector<8x32xf32>
    %173 = vector.extract_strided_slice %163 {offsets = [0, 96], sizes = [8, 32], strides = [1, 1]} : vector<8x128xf32> to vector<8x32xf32>
    %174 = math.tanh %173 : vector<8x32xf32>
    %175 = arith.mulf %171, %155 : vector<8x32xf32>
    %176 = arith.mulf %170, %174 : vector<8x32xf32>
    %177 = arith.addf %175, %176 : vector<8x32xf32>
    %178 = math.tanh %177 : vector<8x32xf32>
    %179 = arith.mulf %172, %178 : vector<8x32xf32>
    %c7_i32 = arith.constant 7 : i32
    %c8_i32_52 = arith.constant 8 : i32
    %180 = arith.muli %c7_i32, %c8_i32_52 : i32
    %181 = tpu.assume_multiple %180, 8 : i32
    %182 = arith.index_cast %181 : i32 to index
    %c0_53 = arith.constant 0 : index
    %183 = vector.load %arg19[%182, %c0_53] : memref<64x128xf32, #tpu.memory_space<vmem>>, vector<8x128xf32>
    %cst_54 = arith.constant dense<0.000000e+00> : vector<8x128xf32>
    %184 = tpu.matmul %179, %23, %cst_54 {dimension_numbers = #tpu.dot_dimension_numbers<[1], [0], [0], [1], [0, 0, 1, 1], [], []>} : vector<8x32xf32>, vector<32x128xf32>, vector<8x128xf32> -> vector<8x128xf32>
    %185 = arith.addf %183, %184 : vector<8x128xf32>
    %186 = vector.extract_strided_slice %185 {offsets = [0, 0], sizes = [8, 96], strides = [1, 1]} : vector<8x128xf32> to vector<8x96xf32>
    %187 = arith.negf %186 : vector<8x96xf32>
    %188 = math.exp %187 : vector<8x96xf32>
    %cst_55 = arith.constant 1.000000e+00 : f32
    %189 = vector.broadcast %cst_55 : f32 to vector<8x96xf32>
    %190 = arith.addf %189, %188 : vector<8x96xf32>
    %191 = arith.divf %189, %190 : vector<8x96xf32>
    %192 = vector.extract_strided_slice %191 {offsets = [0, 0], sizes = [8, 32], strides = [1, 1]} : vector<8x96xf32> to vector<8x32xf32>
    %193 = vector.extract_strided_slice %191 {offsets = [0, 32], sizes = [8, 32], strides = [1, 1]} : vector<8x96xf32> to vector<8x32xf32>
    %194 = vector.extract_strided_slice %191 {offsets = [0, 64], sizes = [8, 32], strides = [1, 1]} : vector<8x96xf32> to vector<8x32xf32>
    %195 = vector.extract_strided_slice %185 {offsets = [0, 96], sizes = [8, 32], strides = [1, 1]} : vector<8x128xf32> to vector<8x32xf32>
    %196 = math.tanh %195 : vector<8x32xf32>
    %197 = arith.mulf %193, %177 : vector<8x32xf32>
    %198 = arith.mulf %192, %196 : vector<8x32xf32>
    %199 = arith.addf %197, %198 : vector<8x32xf32>
    %200 = math.tanh %199 : vector<8x32xf32>
    %201 = arith.mulf %194, %200 : vector<8x32xf32>
    %c8_i32_56 = arith.constant 8 : i32
    %c0_57 = arith.constant 0 : index
    %c0_58 = arith.constant 0 : index
    %202 = vector.load %arg6[%c0_57, %c0_58] : memref<16x32xf32, #tpu.memory_space<vmem>>, vector<16x32xf32>
    %cst_59 = arith.constant dense<0.000000e+00> : vector<8x32xf32>
    %203 = tpu.matmul %5, %202, %cst_59 {dimension_numbers = #tpu.dot_dimension_numbers<[1], [0], [0], [1], [0, 0, 1, 1], [], []>} : vector<8x16xf32>, vector<16x32xf32>, vector<8x32xf32> -> vector<8x32xf32>
    %c0_60 = arith.constant 0 : index
    %c0_61 = arith.constant 0 : index
    %204 = vector.load %arg7[%c0_60, %c0_61] : memref<1x32xf32, #tpu.memory_space<vmem>>, vector<1x32xf32>
    %205 = vector.broadcast %204 : vector<1x32xf32> to vector<8x32xf32>
    %206 = arith.addf %203, %205 : vector<8x32xf32>
    %207 = math.tanh %206 : vector<8x32xf32>
    %c0_62 = arith.constant 0 : index
    %c0_63 = arith.constant 0 : index
    %208 = vector.load %arg12[%c0_62, %c0_63] : memref<32x40xf32, #tpu.memory_space<vmem>>, vector<32x40xf32>
    %cst_64 = arith.constant dense<0.000000e+00> : vector<8x40xf32>
    %209 = tpu.matmul %201, %208, %cst_64 {dimension_numbers = #tpu.dot_dimension_numbers<[1], [0], [0], [1], [0, 0, 1, 1], [], []>} : vector<8x32xf32>, vector<32x40xf32>, vector<8x40xf32> -> vector<8x40xf32>
    %c0_65 = arith.constant 0 : index
    %c0_66 = arith.constant 0 : index
    %210 = vector.load %arg13[%c0_65, %c0_66] : memref<32x40xf32, #tpu.memory_space<vmem>>, vector<32x40xf32>
    %cst_67 = arith.constant dense<0.000000e+00> : vector<8x40xf32>
    %211 = tpu.matmul %207, %210, %cst_67 {dimension_numbers = #tpu.dot_dimension_numbers<[1], [0], [0], [1], [0, 0, 1, 1], [], []>} : vector<8x32xf32>, vector<32x40xf32>, vector<8x40xf32> -> vector<8x40xf32>
    %212 = arith.addf %209, %211 : vector<8x40xf32>
    %c0_68 = arith.constant 0 : index
    %c0_69 = arith.constant 0 : index
    %213 = vector.load %arg14[%c0_68, %c0_69] : memref<1x40xf32, #tpu.memory_space<vmem>>, vector<1x40xf32>
    %214 = vector.broadcast %213 : vector<1x40xf32> to vector<8x40xf32>
    %215 = arith.addf %212, %214 : vector<8x40xf32>
    %216 = arith.negf %215 : vector<8x40xf32>
    %217 = math.exp %216 : vector<8x40xf32>
    %cst_70 = arith.constant 1.000000e+00 : f32
    %218 = vector.broadcast %cst_70 : f32 to vector<8x40xf32>
    %219 = arith.addf %218, %217 : vector<8x40xf32>
    %220 = arith.divf %218, %219 : vector<8x40xf32>
    %c0_71 = arith.constant 0 : index
    %c0_72 = arith.constant 0 : index
    %221 = vector.load %arg15[%c0_71, %c0_72] : memref<40x128xf32, #tpu.memory_space<vmem>>, vector<40x128xf32>
    %cst_73 = arith.constant dense<0.000000e+00> : vector<8x128xf32>
    %222 = tpu.matmul %220, %221, %cst_73 {dimension_numbers = #tpu.dot_dimension_numbers<[1], [0], [0], [1], [0, 0, 1, 1], [], []>} : vector<8x40xf32>, vector<40x128xf32>, vector<8x128xf32> -> vector<8x128xf32>
    %c0_74 = arith.constant 0 : index
    %c0_75 = arith.constant 0 : index
    %223 = vector.load %arg16[%c0_74, %c0_75] : memref<32x128xf32, #tpu.memory_space<vmem>>, vector<32x128xf32>
    %cst_76 = arith.constant dense<0.000000e+00> : vector<8x128xf32>
    %224 = tpu.matmul %207, %223, %cst_76 {dimension_numbers = #tpu.dot_dimension_numbers<[1], [0], [0], [1], [0, 0, 1, 1], [], []>} : vector<8x32xf32>, vector<32x128xf32>, vector<8x128xf32> -> vector<8x128xf32>
    %225 = arith.addf %222, %224 : vector<8x128xf32>
    %c0_77 = arith.constant 0 : index
    %c0_78 = arith.constant 0 : index
    %226 = vector.load %arg17[%c0_77, %c0_78] : memref<1x128xf32, #tpu.memory_space<vmem>>, vector<1x128xf32>
    %227 = vector.broadcast %226 : vector<1x128xf32> to vector<8x128xf32>
    %228 = arith.addf %225, %227 : vector<8x128xf32>
    %c0_79 = arith.constant 0 : index
    %c0_80 = arith.constant 0 : index
    %c0_81 = arith.constant 0 : index
    %229 = vector.load %arg18[%c0_79, %c0_80, %c0_81] : memref<1x8x128xf32, #tpu.memory_space<vmem>>, vector<1x8x128xf32>
    %230 = vector.shape_cast %229 : vector<1x8x128xf32> to vector<8x128xf32>
    %231 = vector.shape_cast %228 : vector<8x128xf32> to vector<1x8x128xf32>
    tpu.vector_store %arg18[%c0_79, %c0_80, %c0_81], %231 {strides = array<i32>} : memref<1x8x128xf32, #tpu.memory_space<vmem>>, vector<1x8x128xf32>,
    return
  }
  func.func @transform_0(%arg0: i32) -> (i32, i32, i32) {
    %c0_i32 = arith.constant 0 : i32
    %c0_i32_0 = arith.constant 0 : i32
    %c0_i32_1 = arith.constant 0 : i32
    return %arg0, %c0_i32, %c0_i32_0 : i32, i32, i32
  }
  func.func @transform_1(%arg0: i32) -> (i32, i32, i32) {
    %c0_i32 = arith.constant 0 : i32
    %c0_i32_0 = arith.constant 0 : i32
    %c0_i32_1 = arith.constant 0 : i32
    return %arg0, %c0_i32, %c0_i32_0 : i32, i32, i32
  }
  func.func @transform_2(%arg0: i32) -> (i32, i32, i32) {
    %c0_i32 = arith.constant 0 : i32
    %c0_i32_0 = arith.constant 0 : i32
    %c0_i32_1 = arith.constant 0 : i32
    return %arg0, %c0_i32, %c0_i32_0 : i32, i32, i32
  }
  func.func @transform_3(%arg0: i32) -> (i32, i32) {
    %c0_i32 = arith.constant 0 : i32
    %c0_i32_0 = arith.constant 0 : i32
    %c0_i32_1 = arith.constant 0 : i32
    return %c0_i32, %c0_i32_0 : i32, i32
  }
  func.func @transform_4(%arg0: i32) -> (i32, i32) {
    %c0_i32 = arith.constant 0 : i32
    %c0_i32_0 = arith.constant 0 : i32
    %c0_i32_1 = arith.constant 0 : i32
    return %c0_i32, %c0_i32_0 : i32, i32
  }
  func.func @transform_5(%arg0: i32) -> (i32, i32) {
    %c0_i32 = arith.constant 0 : i32
    %c0_i32_0 = arith.constant 0 : i32
    %c0_i32_1 = arith.constant 0 : i32
    return %c0_i32, %c0_i32_0 : i32, i32
  }
  func.func @transform_6(%arg0: i32) -> (i32, i32) {
    %c0_i32 = arith.constant 0 : i32
    %c0_i32_0 = arith.constant 0 : i32
    %c0_i32_1 = arith.constant 0 : i32
    return %c0_i32, %c0_i32_0 : i32, i32
  }
  func.func @transform_7(%arg0: i32) -> (i32, i32) {
    %c0_i32 = arith.constant 0 : i32
    %c0_i32_0 = arith.constant 0 : i32
    %c0_i32_1 = arith.constant 0 : i32
    return %c0_i32, %c0_i32_0 : i32, i32
  }
  func.func @transform_8(%arg0: i32) -> (i32, i32) {
    %c0_i32 = arith.constant 0 : i32
    %c0_i32_0 = arith.constant 0 : i32
    %c0_i32_1 = arith.constant 0 : i32
    return %c0_i32, %c0_i32_0 : i32, i32
  }
  func.func @transform_9(%arg0: i32) -> (i32, i32) {
    %c0_i32 = arith.constant 0 : i32
    %c0_i32_0 = arith.constant 0 : i32
    %c0_i32_1 = arith.constant 0 : i32
    return %c0_i32, %c0_i32_0 : i32, i32
  }
  func.func @transform_10(%arg0: i32) -> (i32, i32) {
    %c0_i32 = arith.constant 0 : i32
    %c0_i32_0 = arith.constant 0 : i32
    %c0_i32_1 = arith.constant 0 : i32
    return %c0_i32, %c0_i32_0 : i32, i32
  }
  func.func @transform_11(%arg0: i32) -> (i32, i32) {
    %c0_i32 = arith.constant 0 : i32
    %c0_i32_0 = arith.constant 0 : i32
    %c0_i32_1 = arith.constant 0 : i32
    return %c0_i32, %c0_i32_0 : i32, i32
  }
  func.func @transform_12(%arg0: i32) -> (i32, i32) {
    %c0_i32 = arith.constant 0 : i32
    %c0_i32_0 = arith.constant 0 : i32
    %c0_i32_1 = arith.constant 0 : i32
    return %c0_i32, %c0_i32_0 : i32, i32
  }
  func.func @transform_13(%arg0: i32) -> (i32, i32) {
    %c0_i32 = arith.constant 0 : i32
    %c0_i32_0 = arith.constant 0 : i32
    %c0_i32_1 = arith.constant 0 : i32
    return %c0_i32, %c0_i32_0 : i32, i32
  }
  func.func @transform_14(%arg0: i32) -> (i32, i32) {
    %c0_i32 = arith.constant 0 : i32
    %c0_i32_0 = arith.constant 0 : i32
    %c0_i32_1 = arith.constant 0 : i32
    return %c0_i32, %c0_i32_0 : i32, i32
  }
  func.func @transform_15(%arg0: i32) -> (i32, i32) {
    %c0_i32 = arith.constant 0 : i32
    %c0_i32_0 = arith.constant 0 : i32
    %c0_i32_1 = arith.constant 0 : i32
    return %c0_i32, %c0_i32_0 : i32, i32
  }
  func.func @transform_16(%arg0: i32) -> (i32, i32) {
    %c0_i32 = arith.constant 0 : i32
    %c0_i32_0 = arith.constant 0 : i32
    %c0_i32_1 = arith.constant 0 : i32
    return %c0_i32, %c0_i32_0 : i32, i32
  }
  func.func @transform_17(%arg0: i32) -> (i32, i32, i32) {
    %c0_i32 = arith.constant 0 : i32
    %c0_i32_0 = arith.constant 0 : i32
    %c0_i32_1 = arith.constant 0 : i32
    return %arg0, %c0_i32, %c0_i32_0 : i32, i32, i32
  }
}

</mosaic_0001>

<bundles_post_ra>
// kernel: tpu_custom_call.1
= control target key start
LH: loop header
LB: loop body
LE: loop exit
PB: predicated region body
PF: predicated region fallthrough
CT: control target
= control target key end

     0   :  { %s2882_s0 = inlined_call_operand.vmem [shape: f32[1,64,4], index: 0, kind: input, shape index: {}]   ;;  %s2883_s1 = inlined_call_operand.vmem [shape: f32[1,64,1], index: 1, kind: input, shape index: {}]   ;;  %s2884_s2 = inlined_call_operand.hbm [shape: f32[1,8,16], index: 2, kind: input, shape index: {}]   ;;  %s2885_s3 = inlined_call_operand.hbm [shape: f32[4,8], index: 3, kind: input, shape index: {}]   ;;  %s2886_s4 = inlined_call_operand.vmem [shape: f32[1,8], index: 4, kind: input, shape index: {}]   ;;  %s2887_s5 = inlined_call_operand.hbm [shape: f32[16,32], index: 5, kind: input, shape index: {}]   ;;  %s2888_s6 = inlined_call_operand.vmem [shape: f32[1,32], index: 6, kind: input, shape index: {}]   ;;  %s2889_s7 = inlined_call_operand.hbm [shape: f32[8,128], index: 7, kind: input, shape index: {}]   ;;  %s2890_s8 = inlined_call_operand.hbm [shape: f32[1,128], index: 8, kind: input, shape index: {}]   ;;  %s2891_s9 = inlined_call_operand.vmem [shape: f32[32,128], index: 9, kind: input, shape index: {}]   ;;  %s2892_s10 = inlined_call_operand.hbm [shape: f32[1,128], index: 10, kind: input, shape index: {}]   ;;  %s2893_s11 = inlined_call_operand.vmem [shape: f32[32,40], index: 11, kind: input, shape index: {}]   ;;  %s2894_s12 = inlined_call_operand.vmem [shape: f32[32,40], index: 12, kind: input, shape index: {}]   ;;  %s2895_s13 = inlined_call_operand.vmem [shape: f32[1,40], index: 13, kind: input, shape index: {}]   ;;  %s2896_s14 = inlined_call_operand.vmem [shape: f32[40,128], index: 14, kind: input, shape index: {}]   ;;  %s2897_s15 = inlined_call_operand.vmem [shape: f32[32,128], index: 15, kind: input, shape index: {}]   ;;  %s2898_s16 = inlined_call_operand.vmem [shape: f32[1,128], index: 16, kind: input, shape index: {}]   ;;  %s2899_s17 = inlined_call_operand.hbm [shape: f32[1,8,128], index: 17, kind: output, shape index: {}]  }
   0x1   :  { %2902 = sst [smem:[#allocation20_spill]] %s2882_s0 }
   0x2   :  { %2903 = sst [smem:[#allocation21_spill]] %s2883_s1 }
   0x3   :  { %22 = vsyncpa [#allocation4], 0 }
   0x4   :  { %23 = vsyncpa [#allocation7], 0 }
   0x5   :  { %24 = vsyncpa [#allocation10], 0 }
   0x6   :  { %25 = vsyncpa [#allocation13], 0 }
   0x7   :  { %26 = vsyncpa [#allocation5], 0  ;;  %s2394_s24 = smov [#allocation6]   ;;  %s2395_s26 = smov [#allocation9]  }
   0x8   :  { %s47_s25 = sshll.u32 %s2394_s24, 4  ;;  %s73_s27 = sshll.u32 %s2395_s26, 4  ;;  %s48_s25 = int_to_ptr.vmem [resolvable:$true] %s47_s25  ;;  %s74_s27 = int_to_ptr.vmem [resolvable:$true] %s73_s27 }
   0x9   :  { %s2230_s0 = scalar_lea.hbm %s2885_s3, 64 }
   0xa   :  { %p2231_p0 = scmp.ne.s32.totalorder %s2885_s3, %s2230_s0  ;;  %p2234_p1 = scmp.lt.u32.totalorder %s2230_s0, %s2885_s3 }
   0xc   :  { %p2236_p2 = pnand %p2234_p1, %p2231_p0 }
   0xe   :  { %2239 = shalt.err (!%p2236_p2)
}
   0xf   :  { %s2240_s20 = scalar_lea.vmem %s48_s25, 64  ;;  %p2245_p4 = scmp.lt.s32.totalorder %s48_s25, %s48_s25 }
  0x10   :  { %p2241_p3 = scmp.ne.s32.totalorder %s48_s25, %s2240_s20  ;;  %p2246_p5 = scmp.lt.s32.totalorder %s2240_s20, %s2240_s20 }
  0x12   :  { %p2247_p6 = por %p2246_p5, %p2245_p4 }
  0x14   :  { %p2248_p7 = pnand %p2247_p6, %p2241_p3 }
  0x16   :  { %2251 = shalt.err (!%p2248_p7)
}
  0x17   :  { %50 = dma.hbm_to_vmem [thread:$0]  %s2885_s3, 64, %s48_s25, [#allocation7]  }
  0x18   :  { %s2252_s26 = scalar_lea.hbm %s2889_s7, 128 }
  0x19   :  { %p2253_p8 = scmp.ne.s32.totalorder %s2889_s7, %s2252_s26  ;;  %p2256_p9 = scmp.lt.u32.totalorder %s2252_s26, %s2889_s7 }
  0x1b   :  { %p2258_p10 = pnand %p2256_p9, %p2253_p8 }
  0x1d   :  { %2261 = shalt.err (!%p2258_p10)
}
  0x1e   :  { %s2262_s18 = scalar_lea.vmem %s74_s27, 128  ;;  %p2267_p12 = scmp.lt.s32.totalorder %s74_s27, %s74_s27 }
  0x1f   :  { %p2263_p11 = scmp.ne.s32.totalorder %s74_s27, %s2262_s18  ;;  %p2268_p13 = scmp.lt.s32.totalorder %s2262_s18, %s2262_s18 }
  0x21   :  { %p2269_p0 = por %p2268_p13, %p2267_p12 }
  0x23   :  { %p2270_p1 = pnand %p2269_p0, %p2263_p11 }
  0x25   :  { %2273 = shalt.err (!%p2270_p1)
}
  0x26   :  { %76 = dma.hbm_to_vmem [thread:$0]  %s2889_s7, 128, %s74_s27, [#allocation10]  }
  0x27   :  { %s2396_s19 = smov [#allocation3]   ;;  %s2397_s20 = smov [#allocation8]  }
  0x28   :  { %s37_s1 = sshll.u32 %s2396_s19, 4  ;;  %s58_s21 = sshll.u32 %s2397_s20, 4  ;;  %s38_s1 = int_to_ptr.vmem [resolvable:$true] %s37_s1  ;;  %s2523_s21 = int_to_ptr.vmem [resolvable:$true] %s58_s21 }
  0x29   :  { %s2274_s24 = scalar_lea.hbm %s2884_s2, 128 }
  0x2a   :  { %p2275_p2 = scmp.ne.s32.totalorder %s2884_s2, %s2274_s24  ;;  %p2278_p3 = scmp.lt.u32.totalorder %s2274_s24, %s2884_s2 }
  0x2c   :  { %p2280_p4 = pnand %p2278_p3, %p2275_p2 }
  0x2e   :  { %2283 = shalt.err (!%p2280_p4)
}
  0x2f   :  { %s2284_s7 = scalar_lea.vmem %s38_s1, 128  ;;  %p2289_p6 = scmp.lt.s32.totalorder %s38_s1, %s38_s1 }
  0x30   :  { %p2285_p5 = scmp.ne.s32.totalorder %s38_s1, %s2284_s7  ;;  %p2290_p7 = scmp.lt.s32.totalorder %s2284_s7, %s2284_s7 }
  0x32   :  { %p2291_p8 = por %p2290_p7, %p2289_p6 }
  0x34   :  { %p2292_p9 = pnand %p2291_p8, %p2285_p5 }
  0x36   :  { %2295 = shalt.err (!%p2292_p9)
}
  0x37   :  { %40 = dma.hbm_to_vmem [thread:$0]  %s2884_s2, 128, %s38_s1, [#allocation4]  }
  0x38   :  { %s2296_s25 = scalar_lea.hbm %s2887_s5, 256 }
  0x39   :  { %p2297_p10 = scmp.ne.s32.totalorder %s2887_s5, %s2296_s25  ;;  %p2300_p11 = scmp.lt.u32.totalorder %s2296_s25, %s2887_s5 }
  0x3b   :  { %p2302_p12 = pnand %p2300_p11, %p2297_p10 }
  0x3d   :  { %2305 = shalt.err (!%p2302_p12)
}
  0x3e   :  { %s2306_s24 = scalar_lea.vmem %s2523_s21, 256  ;;  %p2311_p0 = scmp.lt.s32.totalorder %s2523_s21, %s2523_s21 }
  0x3f   :  { %p2307_p13 = scmp.ne.s32.totalorder %s2523_s21, %s2306_s24  ;;  %p2312_p1 = scmp.lt.s32.totalorder %s2306_s24, %s2306_s24 }
  0x41   :  { %p2313_p2 = por %p2312_p1, %p2311_p0 }
  0x43   :  { %p2314_p3 = pnand %p2313_p2, %p2307_p13 }
  0x45   :  { %2317 = shalt.err (!%p2314_p3)
}
  0x46   :  { %s2398_s2 = smov 128   ;;  %s2399_s1 = smov 8  }
  0x47   :  { %64 = dma.hbm_to_vmem [thread:$0]  %s2887_s5, 256, %s2523_s21, [#allocation7], %s2398_s2, %s2398_s2, %s2399_s1  }
  0x48   :  { %s2400_s29 = smov [#allocation11]   ;;  %s2401_s7 = smov [#allocation12]  }
  0x49   :  { %s83_s0 = sshll.u32 %s2400_s29, 4  ;;  %s95_s27 = sshll.u32 %s2401_s7, 4  ;;  %s84_s0 = int_to_ptr.vmem [resolvable:$true] %s83_s0  ;;  %s96_s27 = int_to_ptr.vmem [resolvable:$true] %s95_s27 }
  0x4a   :  { %s2318_s3 = scalar_lea.hbm %s2890_s8, 16 }
  0x4b   :  { %p2319_p4 = scmp.ne.s32.totalorder %s2890_s8, %s2318_s3  ;;  %p2322_p5 = scmp.lt.u32.totalorder %s2318_s3, %s2890_s8 }
  0x4d   :  { %p2324_p6 = pnand %p2322_p5, %p2319_p4 }
  0x4f   :  { %2327 = shalt.err (!%p2324_p6)
}
  0x50   :  { %s2328_s5 = scalar_lea.vmem %s84_s0, 16  ;;  %s2332_s21 = scalar_lea.vmem %s84_s0, 32 }
  0x51   :  { %p2329_p7 = scmp.ne.s32.totalorder %s84_s0, %s2328_s5  ;;  %p2333_p8 = scmp.lt.s32.totalorder %s84_s0, %s84_s0 }
  0x52   :  { %p2334_p9 = scmp.lt.s32.totalorder %s2332_s21, %s2328_s5 }
  0x54   :  { %p2335_p10 = por %p2334_p9, %p2333_p8 }
  0x56   :  { %p2336_p11 = pnand %p2335_p10, %p2329_p7 }
  0x58   :  { %2339 = shalt.err (!%p2336_p11)
}
  0x59   :  { %86 = dma.hbm_to_vmem [thread:$0]  %s2890_s8, 16, %s84_s0, [#allocation10]  }
  0x5a   :  { %s2340_s26 = scalar_lea.hbm %s2892_s10, 16 }
  0x5b   :  { %p2341_p12 = scmp.ne.s32.totalorder %s2892_s10, %s2340_s26  ;;  %p2344_p13 = scmp.lt.u32.totalorder %s2340_s26, %s2892_s10 }
  0x5d   :  { %p2346_p0 = pnand %p2344_p13, %p2341_p12 }
  0x5f   :  { %2349 = shalt.err (!%p2346_p0)
}
  0x60   :  { %s2350_s18 = scalar_lea.vmem %s96_s27, 16  ;;  %s2354_s3 = scalar_lea.vmem %s96_s27, 32 }
  0x61   :  { %p2351_p1 = scmp.ne.s32.totalorder %s96_s27, %s2350_s18  ;;  %p2355_p2 = scmp.lt.s32.totalorder %s96_s27, %s96_s27 }
  0x62   :  { %p2356_p3 = scmp.lt.s32.totalorder %s2354_s3, %s2350_s18 }
  0x64   :  { %p2357_p4 = por %p2356_p3, %p2355_p2 }
  0x66   :  { %p2358_p5 = pnand %p2357_p4, %p2351_p1 }
  0x68   :  { %2361 = shalt.err (!%p2358_p5)
}
  0x69   :  { %98 = dma.hbm_to_vmem [thread:$0]  %s2892_s10, 16, %s96_s27, [#allocation13]  }
  0x6a   :  { %2384 = dma.done.wait [#allocation4], 128  }
  0x6b   :  { %2385 = vsyncadd [#allocation4], 4294967168 }
  0x6c   :  { %2386 = dma.done.wait [#allocation7], 320  }
  0x6d   :  { %2387 = vsyncadd [#allocation7], 4294966976 }
  0x6e   :  { %2388 = dma.done.wait [#allocation10], 144  }
  0x6f   :  { %2389 = vsyncadd [#allocation10], 4294967152 }
  0x70   :  { %2390 = dma.done.wait [#allocation13], 16  }
  0x71   :  { %2391 = vsyncadd [#allocation13], 4294967280  ;;  %vm179_vm0 = vcmask 1043456   ;;  %vm154_vm1 = vcmask 31744   ;;  %v146_v0 = vld [vmem:[#allocation6] sm:$0xf] }
  0x72   :  { %s2904_s20 = sld [smem:[#allocation20_spill]]  ;;  %1883 = vmatprep.subr.msk.mxu0 %vm179_vm0, %v146_v0  ;;  %v505_v4 = vld [vmem:[%s2891_s9] sm:$0xff]  ;;  %v506_v5 = vld [vmem:[%s2891_s9 + $0x8] sm:$0xff]  ;;  %v2402_v6 = vmov 0.0|0.0   ;;  %v507_v10 = vld [vmem:[%s2891_s9 + $0x10] sm:$0xff]  ;;  %s2905_s27 = sld [smem:[#allocation21_spill]] }
  0x73   :  { %1884 = vmatpush3.msk.msra.mxu0 %vm179_vm0, %v146_v0  ;;  %v2597_v7 = vpack.c.bf16 %v506_v5, %v505_v4  ;;  %v508_v11 = vld [vmem:[%s2891_s9 + $0x18] sm:$0xff]  ;;  %vm2403_vm2 = vmmov 0   ;;  %v2404_v18 = vmov 0.0   ;;  %v2405_v19 = vmov 0   ;;  %v1757_v20 = vld [vmem:[%s2886_s4] ss:$0 sm:$0xff] }
  0x74   :  { %2052 = vmatprep.subr.bf16.mxu0 %v2402_v6  ;;  %v2617_v13 = vpack.c.bf16 %v508_v11, %v507_v10  ;;  %v296_v14 = vld [vmem:[#allocation9] sm:$0xff]  ;;  %2142 = vset.pattern.permute.xlu0 %v2405_v19  ;;  %vm352_vm3 = vcmask 64512   ;;  %v2661_v47 = vld [vmem:[#allocation11] ss:$0 sm:$0xff]  ;;  %v2664_v52 = vld [vmem:[#allocation12] ss:$0 sm:$0xff] }
  0x75   :  { %1897 = vmatprep.subr.mxu1 %v296_v14  ;;  %2143 = vset.pattern.permute.xlu1 %v2405_v19  ;;  %s2406_s4 = smov 32   ;;  %s2407_s2 = smov 64   ;;  %vm510_vm4 = vcmask 261120   ;;  %vm1332_vm5 = vcmask 130048   ;;  %vm1656_vm6 = vcmask 326656  }
  0x76   :  { %1898 = vmatpush3.msra.mxu1 %v296_v14  ;;  %s2408_s29 = smov [#allocation14]  }
  0x77   :  { %2058 = vmatprep.subr.bf16.mxu1 %v2402_v6  ;;  %s1745_s7 = sshll.u32 %s2408_s29, 4  ;;  %s1746_s7 = int_to_ptr.vmem [resolvable:$true] %s1745_s7 }
  0x78   :  { %v129_v1 = vld [vmem:[%s2904_s20] sm:$0xff]  ;;  %v130_v2 = vld [vmem:[%s2904_s20 + $0x8] sm:$0xff]  ;;  %v131_v3 = vld [vmem:[%s2904_s20 + $0x10] sm:$0xff]  ;;  %p2367_p7 = scmp.lt.s32.totalorder %s1746_s7, %s1746_s7 }
  0x79   :  { %1885 = vmatprep.mubr.msk.f32.mxu0 %vm154_vm1, %v129_v1  ;;  %v132_v8 = vld [vmem:[%s2904_s20 + $0x18] sm:$0xff]  ;;  %v133_v9 = vld [vmem:[%s2904_s20 + $0x20] sm:$0xff]  ;;  %v134_v12 = vld [vmem:[%s2904_s20 + $0x28] sm:$0xff] }
  0x7a   :  { %1886 = vmatmul.mubr.msk.f32.vlgmr.msra.gmra.mrb[0].mxu0 %vm154_vm1, %v130_v2  ;;  %v135_v15 = vld [vmem:[%s2904_s20 + $0x30] sm:$0xff]  ;;  %v136_v16 = vld [vmem:[%s2904_s20 + $0x38] sm:$0xff]  ;;  %v137_v17 = vld [vmem:[%s2905_s27] sm:$0xff] }
  0x7b   :  { %1888 = vmatprep.mubr.msk.f32.mxu0 %vm154_vm1, %v131_v3  ;;  %2054 = vmatpush3.bf16.msra.mxu0 %v2597_v7  ;;  %v138_v11 = vld [vmem:[%s2905_s27 + $0x8] sm:$0xff] }
  0x7c   :  { %2055 = vmatprep.subr.bf16.mxu0 %v2402_v6  ;;  %300 = vperm.xlu0 %2142, %v137_v17  }
  0x7e   :  { %1889 = vmatmul.mubr.msk.f32.gmra.mrb[2].mxu0 %vm154_vm1, %v132_v8 }
  0x7f   :  { %1891 = vmatprep.mubr.msk.f32.mxu0 %vm154_vm1, %v133_v9  ;;  %2057 = vmatpush3.bf16.msra.mxu0 %v2617_v13 }
  0x80   :  { %2064 = vmatprep.subr.bf16.mxu0 %v2402_v6 }
  0x82   :  { %1892 = vmatmul.mubr.msk.f32.gmra.mrb[4].mxu0 %vm154_vm1, %v134_v12 }
  0x83   :  { %1894 = vmatprep.mubr.msk.f32.mxu0 %vm154_vm1, %v135_v15 }
  0x86   :  { %1895 = vmatmul.mubr.msk.f32.gmra.mrb[6].mxu0 %vm154_vm1, %v136_v16 }
  0x87   :  { %1919 = vmatprep.mubr.msk.f32.mxu0 %vm2403_vm2, %v2404_v18 }
  0x8a   :  { %1920 = vmatmul.mubr.f32.vlgmr.msra.gmra.mrb[8].mxu0 %v2404_v18 }
  0x8b   :  { %2066 = vmatpush3.bf16.msra.mxu0 %v2597_v7  ;;  %1941 = vmatprep.mubr.msk.f32.mxu0 %vm2403_vm2, %v2404_v18 }
  0x8c   :  { %2067 = vmatprep.subr.bf16.mxu0 %v2402_v6 }
  0x8f   :  { %2069 = vmatpush3.bf16.msra.mxu0 %v2617_v13 }
  0x90   :  { %2076 = vmatprep.subr.bf16.mxu0 %v2402_v6 }
  0xfb   :  { %v301_v48 = vpop.permute.xlu0 %300 }
  0xfc   :  { %v344_v49 = vmul.f32 %v2661_v47, %v301_v48 }
 0x14d   :  { %v1887_v21 = vpop.f32.mrb[0].mxu0 }
 0x14e   :  { %v255_v22 = vadd.f32 %v1887_v21, %v1757_v20  ;;  %v249_v23 = vpop.f32.mrb[1].mxu0 }
 0x14f   :  { %v250_v24 = vadd.f32 %v1757_v20, %v249_v23 }
 0x151   :  { %2144 = vtanh.f32 %v250_v24  ;;  %v1890_v27 = vpop.f32.mrb[2].mxu0 }
 0x152   :  { %2146 = vtanh.f32 %v255_v22  ;;  %v265_v28 = vadd.f32 %v1890_v27, %v1757_v20  ;;  %v259_v29 = vpop.f32.mrb[3].mxu0 }
 0x153   :  { %v260_v30 = vadd.f32 %v1757_v20, %v259_v29 }
 0x154   :  { %2148 = vtanh.f32 %v265_v28 }
 0x155   :  { %2150 = vtanh.f32 %v260_v30  ;;  %v1893_v31 = vpop.f32.mrb[4].mxu0 }
 0x156   :  { %v275_v32 = vadd.f32 %v1893_v31, %v1757_v20  ;;  %v269_v33 = vpop.f32.mrb[5].mxu0 }
 0x157   :  { %v270_v34 = vadd.f32 %v1757_v20, %v269_v33 }
 0x158   :  { %2152 = vtanh.f32 %v275_v32 }
 0x159   :  { %2154 = vtanh.f32 %v270_v34  ;;  %v1896_v35 = vpop.f32.mrb[6].mxu0 }
 0x15a   :  { %v285_v36 = vadd.f32 %v1896_v35, %v1757_v20  ;;  %v279_v37 = vpop.f32.mrb[7].mxu0  ;;  %v139_v35 = vld [vmem:[%s2905_s27 + $0x10] sm:$0xff] }
 0x15b   :  { %v2145_v25 = vpop.eup %2144  ;;  %v280_v38 = vadd.f32 %v1757_v20, %v279_v37 }
 0x15c   :  { %v2147_v26 = vpop.eup %2146  ;;  %1899 = vmatprep.mubr.msk.f32.mxu1 %vm352_vm3, %v2145_v25  ;;  %2156 = vtanh.f32 %v285_v36 }
 0x15d   :  { %1900 = vmatmul.mubr.msk.f32.vlgmr.msra.gmra.mrb[0].mxu1 %vm352_vm3, %v2147_v26  ;;  %2158 = vtanh.f32 %v280_v38  ;;  %v580_v41 = vpop.f32.mrb[8].mxu0 }
 0x15e   :  { %2060 = vmatpush3.bf16.msra.mxu1 %v2597_v7  ;;  %v2149_v39 = vpop.eup %2148  ;;  %v1921_v42 = vpop.f32.mrb[9].mxu0 }
 0x15f   :  { %2061 = vmatprep.subr.bf16.mxu1 %v2402_v6  ;;  %v2151_v40 = vpop.eup %2150 }
 0x160   :  { %1902 = vmatprep.mubr.msk.f32.mxu1 %vm352_vm3, %v2151_v40 }
 0x161   :  { %1903 = vmatmul.mubr.msk.f32.gmra.mrb[2].mxu1 %vm352_vm3, %v2149_v39 }
 0x162   :  { %2063 = vmatpush3.bf16.msra.mxu1 %v2617_v13  ;;  %v2153_v43 = vpop.eup %2152 }
 0x163   :  { %2070 = vmatprep.subr.bf16.mxu1 %v2402_v6  ;;  %v2155_v44 = vpop.eup %2154 }
 0x164   :  { %1905 = vmatprep.mubr.msk.f32.mxu1 %vm352_vm3, %v2155_v44 }
 0x165   :  { %1906 = vmatmul.mubr.msk.f32.gmra.mrb[4].mxu1 %vm352_vm3, %v2153_v43 }
 0x166   :  { %v2157_v45 = vpop.eup %2156 }
 0x167   :  { %v2159_v46 = vpop.eup %2158 }
 0x168   :  { %1908 = vmatprep.mubr.msk.f32.mxu1 %vm352_vm3, %v2159_v46 }
 0x169   :  { %1909 = vmatmul.mubr.msk.f32.gmra.mrb[6].mxu1 %vm352_vm3, %v2157_v45 }
 0x16a   :  { %1930 = vmatprep.mubr.msk.f32.mxu1 %vm2403_vm2, %v2404_v18 }
 0x230   :  { %v1901_v50 = vpop.f32.mrb[0].mxu1 }
 0x231   :  { %v443_v51 = vpop.f32.mrb[1].mxu1 }
 0x232   :  { %v444_v53 = vadd.f32 %v443_v51, %v344_v49 }
 0x234   :  { %v489_v54 = vadd.f32 %v2664_v52, %v444_v53  ;;  %v2668_v57 = vpop.f32.mrb[2].mxu1 }
 0x235   :  { %v2670_v58 = vpop.f32.mrb[3].mxu1 }
 0x236   :  { %v584_v55 = vadd.f32 %v580_v41, %v489_v54 }
 0x238   :  { %2160 = vtanh.f32 %v584_v55  ;;  %v2672_v59 = vpop.f32.mrb[4].mxu1  ;;  %v1777_v63 = vmul.f32 -1.442695, %v584_v55 }
 0x239   :  { %v2674_v60 = vpop.f32.mrb[5].mxu1 }
 0x23a   :  { %2162 = vpow2.f32 %v1777_v63 }
 0x23c   :  { %v2676_v61 = vpop.f32.mrb[6].mxu1 }
 0x23d   :  { %v2678_v62 = vpop.f32.mrb[7].mxu1 }
 0x242   :  { %v2161_v56 = vpop.eup %2160 }
 0x243   :  { %594 = vrot.lane.b32.xlu0 %v2161_v56, %s2406_s4 }
 0x244   :  { %v2163_v0 = vpop.eup %2162 }
 0x245   :  { %v588_v1 = vadd.f32 1.0, %v2163_v0  ;;  %v140_v0 = vld [vmem:[%s2905_s27 + $0x18] sm:$0xff] }
 0x247   :  { %2164 = vrcp.f32 %v588_v1 }
 0x251   :  { %v2165_v2 = vpop.eup %2164 }
 0x252   :  { %v592_v5 = vmul.f32 0.0, %v2165_v2 }
 0x2b5   :  { %v595_v3 = vpop.permute.xlu0 %594 }
 0x2b6   :  { %v597_v4 = vmul.f32 %v2165_v2, %v595_v3 }
 0x2b8   :  { %599 = vrot.lane.b32.xlu1 %v597_v4, %s2406_s4 }
 0x32a   :  { %v600_v8 = vpop.permute.xlu1 %599 }
 0x32b   :  { %v602_v9 = vadd.f32 %v600_v8, %v592_v5 }
 0x32d   :  { %2166 = vtanh.f32 %v602_v9 }
 0x337   :  { %v2167_v10 = vpop.eup %2166 }
 0x338   :  { %605 = vrot.lane.b32.xlu1 %v2167_v10, %s2406_s4 }
 0x33c   :  { %305 = vperm.xlu1 %2143, %v138_v11  }
 0x3aa   :  { %v606_v12 = vpop.permute.xlu1 %605 }
 0x3ab   :  { %v608_v14 = vmul.f32 %v2165_v2, %v606_v12 }
 0x3ad   :  { %612 = vrot.lane.b32.xlu0 %v608_v14, %s2407_s2 }
 0x3bb   :  { %v306_v16 = vpop.permute.xlu1 %305 }
 0x3bc   :  { %v345_v17 = vmul.f32 %v2661_v47, %v306_v16 }
 0x3be   :  { %v449_v19 = vadd.f32 %v1901_v50, %v345_v17 }
 0x3c0   :  { %v490_v20 = vadd.f32 %v2664_v52, %v449_v19 }
 0x41f   :  { %v613_v15 = vpop.permute.xlu0 %612 }
 0x420   :  { %1931 = vmatmul.mubr.msk.f32.vlgmr.msra.gmra.mrb[8].mxu1 %vm510_vm4, %v613_v15 }
 0x421   :  { %2072 = vmatpush3.bf16.msra.mxu1 %v2597_v7  ;;  %1952 = vmatprep.mubr.msk.f32.mxu1 %vm2403_vm2, %v2404_v18 }
 0x422   :  { %2073 = vmatprep.subr.bf16.mxu1 %v2402_v6 }
 0x425   :  { %2075 = vmatpush3.bf16.msra.mxu1 %v2617_v13 }
 0x426   :  { %2082 = vmatprep.subr.bf16.mxu1 %v2402_v6 }
 0x4f3   :  { %v682_v21 = vpop.f32.mrb[8].mxu1 }
 0x4f4   :  { %v686_v22 = vadd.f32 %v682_v21, %v490_v20  ;;  %v1932_v23 = vpop.f32.mrb[9].mxu1 }
 0x4f6   :  { %2168 = vtanh.f32 %v686_v22  ;;  %v1779_v25 = vmul.f32 -1.442695, %v686_v22 }
 0x4f8   :  { %2170 = vpow2.f32 %v1779_v25  ;;  %v141_v25 = vld [vmem:[%s2905_s27 + $0x20] sm:$0xff] }
 0x500   :  { %v2169_v24 = vpop.eup %2168 }
 0x501   :  { %696 = vrot.lane.b32.xlu0 %v2169_v24, %s2406_s4 }
 0x502   :  { %v2171_v26 = vpop.eup %2170 }
 0x503   :  { %v690_v27 = vadd.f32 1.0, %v2171_v26 }
 0x505   :  { %2172 = vrcp.f32 %v690_v27 }
 0x50f   :  { %v2173_v28 = vpop.eup %2172 }
 0x510   :  { %v694_v31 = vmul.f32 %v2173_v28, %v602_v9 }
 0x573   :  { %v697_v29 = vpop.permute.xlu0 %696 }
 0x574   :  { %v699_v30 = vmul.f32 %v2173_v28, %v697_v29 }
 0x576   :  { %701 = vrot.lane.b32.xlu1 %v699_v30, %s2406_s4 }
 0x5e8   :  { %v702_v32 = vpop.permute.xlu1 %701 }
 0x5e9   :  { %v704_v33 = vadd.f32 %v702_v32, %v694_v31 }
 0x5eb   :  { %2174 = vtanh.f32 %v704_v33 }
 0x5f5   :  { %v2175_v34 = vpop.eup %2174 }
 0x5f6   :  { %707 = vrot.lane.b32.xlu0 %v2175_v34, %s2406_s4 }
 0x5fa   :  { %310 = vperm.xlu0 %2142, %v139_v35  }
 0x668   :  { %v708_v36 = vpop.permute.xlu0 %707 }
 0x669   :  { %v710_v37 = vmul.f32 %v2173_v28, %v708_v36 }
 0x66b   :  { %714 = vrot.lane.b32.xlu1 %v710_v37, %s2407_s2 }
 0x679   :  { %v311_v39 = vpop.permute.xlu0 %310 }
 0x67a   :  { %v346_v40 = vmul.f32 %v2661_v47, %v311_v39 }
 0x67c   :  { %v454_v41 = vadd.f32 %v2670_v58, %v346_v40 }
 0x67e   :  { %v491_v42 = vadd.f32 %v2664_v52, %v454_v41 }
 0x6dd   :  { %v715_v38 = vpop.permute.xlu1 %714 }
 0x6de   :  { %1942 = vmatmul.mubr.msk.f32.vlgmr.msra.gmra.mrb[10].mxu0 %vm510_vm4, %v715_v38 }
 0x6df   :  { %2078 = vmatpush3.bf16.msra.mxu0 %v2597_v7  ;;  %1963 = vmatprep.mubr.msk.f32.mxu0 %vm2403_vm2, %v2404_v18 }
 0x6e0   :  { %2079 = vmatprep.subr.bf16.mxu0 %v2402_v6 }
 0x6e3   :  { %2081 = vmatpush3.bf16.msra.mxu0 %v2617_v13 }
 0x6e4   :  { %2088 = vmatprep.subr.bf16.mxu0 %v2402_v6 }
 0x7b1   :  { %v784_v43 = vpop.f32.mrb[10].mxu0 }
 0x7b2   :  { %v788_v44 = vadd.f32 %v784_v43, %v491_v42  ;;  %v1943_v45 = vpop.f32.mrb[11].mxu0 }
 0x7b4   :  { %2176 = vtanh.f32 %v788_v44  ;;  %v1781_v48 = vmul.f32 -1.442695, %v788_v44 }
 0x7b6   :  { %2178 = vpow2.f32 %v1781_v48 }
 0x7be   :  { %v2177_v46 = vpop.eup %2176 }
 0x7bf   :  { %798 = vrot.lane.b32.xlu1 %v2177_v46, %s2406_s4  ;;  %v142_v46 = vld [vmem:[%s2905_s27 + $0x28] sm:$0xff] }
 0x7c0   :  { %v2179_v49 = vpop.eup %2178 }
 0x7c1   :  { %v792_v50 = vadd.f32 1.0, %v2179_v49 }
 0x7c3   :  { %2180 = vrcp.f32 %v792_v50 }
 0x7cd   :  { %v2181_v51 = vpop.eup %2180 }
 0x7ce   :  { %v796_v55 = vmul.f32 %v2181_v51, %v704_v33 }
 0x831   :  { %v799_v53 = vpop.permute.xlu1 %798 }
 0x832   :  { %v801_v54 = vmul.f32 %v2181_v51, %v799_v53 }
 0x834   :  { %803 = vrot.lane.b32.xlu0 %v801_v54, %s2406_s4 }
 0x8a6   :  { %v804_v56 = vpop.permute.xlu0 %803 }
 0x8a7   :  { %v806_v58 = vadd.f32 %v804_v56, %v796_v55 }
 0x8a9   :  { %2182 = vtanh.f32 %v806_v58 }
 0x8b3   :  { %v2183_v63 = vpop.eup %2182 }
 0x8b4   :  { %809 = vrot.lane.b32.xlu1 %v2183_v63, %s2406_s4 }
 0x8b8   :  { %315 = vperm.xlu1 %2143, %v140_v0  }
 0x926   :  { %v810_v1 = vpop.permute.xlu1 %809 }
 0x927   :  { %v812_v2 = vmul.f32 %v2181_v51, %v810_v1 }
 0x929   :  { %816 = vrot.lane.b32.xlu0 %v812_v2, %s2407_s2 }
 0x937   :  { %v316_v4 = vpop.permute.xlu1 %315 }
 0x938   :  { %v347_v5 = vmul.f32 %v2661_v47, %v316_v4 }
 0x93a   :  { %v459_v8 = vadd.f32 %v2668_v57, %v347_v5 }
 0x93c   :  { %v492_v9 = vadd.f32 %v2664_v52, %v459_v8 }
 0x99b   :  { %v817_v3 = vpop.permute.xlu0 %816 }
 0x99c   :  { %1953 = vmatmul.mubr.msk.f32.vlgmr.msra.gmra.mrb[10].mxu1 %vm510_vm4, %v817_v3 }
 0x99d   :  { %2084 = vmatpush3.bf16.msra.mxu1 %v2597_v7  ;;  %1974 = vmatprep.mubr.msk.f32.mxu1 %vm2403_vm2, %v2404_v18 }
 0x99e   :  { %2085 = vmatprep.subr.bf16.mxu1 %v2402_v6 }
 0x9a1   :  { %2087 = vmatpush3.bf16.msra.mxu1 %v2617_v13 }
 0x9a2   :  { %2094 = vmatprep.subr.bf16.mxu1 %v2402_v6 }
 0xa6f   :  { %v886_v10 = vpop.f32.mrb[10].mxu1 }
 0xa70   :  { %v890_v11 = vadd.f32 %v886_v10, %v492_v9  ;;  %v1954_v12 = vpop.f32.mrb[11].mxu1  ;;  %v143_v10 = vld [vmem:[%s2905_s27 + $0x30] sm:$0xff] }
 0xa72   :  { %2184 = vtanh.f32 %v890_v11  ;;  %v1783_v15 = vmul.f32 -1.442695, %v890_v11 }
 0xa74   :  { %2186 = vpow2.f32 %v1783_v15 }
 0xa7c   :  { %v2185_v14 = vpop.eup %2184 }
 0xa7d   :  { %900 = vrot.lane.b32.xlu0 %v2185_v14, %s2406_s4 }
 0xa7e   :  { %v2187_v16 = vpop.eup %2186 }
 0xa7f   :  { %v894_v17 = vadd.f32 1.0, %v2187_v16 }
 0xa81   :  { %2188 = vrcp.f32 %v894_v17 }
 0xa8b   :  { %v2189_v19 = vpop.eup %2188 }
 0xa8c   :  { %v898_v57 = vmul.f32 %v2189_v19, %v806_v58 }
 0xaef   :  { %v901_v20 = vpop.permute.xlu0 %900 }
 0xaf0   :  { %v903_v21 = vmul.f32 %v2189_v19, %v901_v20 }
 0xaf2   :  { %905 = vrot.lane.b32.xlu1 %v903_v21, %s2406_s4 }
 0xb64   :  { %v906_v22 = vpop.permute.xlu1 %905 }
 0xb65   :  { %v908_v23 = vadd.f32 %v906_v22, %v898_v57 }
 0xb67   :  { %2190 = vtanh.f32 %v908_v23 }
 0xb71   :  { %v2191_v24 = vpop.eup %2190 }
 0xb72   :  { %911 = vrot.lane.b32.xlu0 %v2191_v24, %s2406_s4 }
 0xb76   :  { %320 = vperm.xlu0 %2142, %v141_v25  }
 0xbe4   :  { %v912_v26 = vpop.permute.xlu0 %911 }
 0xbe5   :  { %v914_v27 = vmul.f32 %v2189_v19, %v912_v26 }
 0xbe7   :  { %918 = vrot.lane.b32.xlu1 %v914_v27, %s2407_s2 }
 0xbf5   :  { %v321_v29 = vpop.permute.xlu0 %320 }
 0xbf6   :  { %v348_v30 = vmul.f32 %v2661_v47, %v321_v29 }
 0xbf8   :  { %v464_v31 = vadd.f32 %v2674_v60, %v348_v30 }
 0xbfa   :  { %v493_v32 = vadd.f32 %v2664_v52, %v464_v31 }
 0xc59   :  { %v919_v28 = vpop.permute.xlu1 %918 }
 0xc5a   :  { %1964 = vmatmul.mubr.msk.f32.vlgmr.msra.gmra.mrb[12].mxu0 %vm510_vm4, %v919_v28 }
 0xc5b   :  { %2090 = vmatpush3.bf16.msra.mxu0 %v2597_v7  ;;  %1985 = vmatprep.mubr.msk.f32.mxu0 %vm2403_vm2, %v2404_v18 }
 0xc5c   :  { %2091 = vmatprep.subr.bf16.mxu0 %v2402_v6 }
 0xc5f   :  { %2093 = vmatpush3.bf16.msra.mxu0 %v2617_v13 }
 0xc60   :  { %2109 = vmatprep.subr.bf16.mxu0 %v2402_v6 }
 0xd2d   :  { %v988_v33 = vpop.f32.mrb[12].mxu0 }
 0xd2e   :  { %v992_v34 = vadd.f32 %v988_v33, %v493_v32  ;;  %v1965_v35 = vpop.f32.mrb[13].mxu0  ;;  %v144_v32 = vld [vmem:[%s2905_s27 + $0x38] sm:$0xff] }
 0xd30   :  { %2192 = vtanh.f32 %v992_v34  ;;  %v1785_v37 = vmul.f32 -1.442695, %v992_v34 }
 0xd32   :  { %2194 = vpow2.f32 %v1785_v37 }
 0xd3a   :  { %v2193_v36 = vpop.eup %2192 }
 0xd3b   :  { %1002 = vrot.lane.b32.xlu1 %v2193_v36, %s2406_s4 }
 0xd3c   :  { %v2195_v38 = vpop.eup %2194 }
 0xd3d   :  { %v996_v39 = vadd.f32 1.0, %v2195_v38 }
 0xd3f   :  { %2196 = vrcp.f32 %v996_v39 }
 0xd49   :  { %v2197_v40 = vpop.eup %2196 }
 0xd4a   :  { %v1000_v60 = vmul.f32 %v2197_v40, %v908_v23 }
 0xdad   :  { %v1003_v41 = vpop.permute.xlu1 %1002 }
 0xdae   :  { %v1005_v42 = vmul.f32 %v2197_v40, %v1003_v41 }
 0xdb0   :  { %1007 = vrot.lane.b32.xlu0 %v1005_v42, %s2406_s4 }
 0xe22   :  { %v1008_v43 = vpop.permute.xlu0 %1007 }
 0xe23   :  { %v1010_v44 = vadd.f32 %v1008_v43, %v1000_v60 }
 0xe25   :  { %2198 = vtanh.f32 %v1010_v44 }
 0xe2f   :  { %v2199_v45 = vpop.eup %2198 }
 0xe30   :  { %1013 = vrot.lane.b32.xlu1 %v2199_v45, %s2406_s4 }
 0xe34   :  { %325 = vperm.xlu1 %2143, %v142_v46   ;;  %v1323_v46 = vld [vmem:[#allocation8] sm:$0xff] }
 0xea2   :  { %v1014_v48 = vpop.permute.xlu1 %1013 }
 0xea3   :  { %v1016_v49 = vmul.f32 %v2197_v40, %v1014_v48  ;;  %v1324_v48 = vld [vmem:[#allocation8 + $0x8] sm:$0xff] }
 0xea5   :  { %1020 = vrot.lane.b32.xlu0 %v1016_v49, %s2407_s2  ;;  %v2101_v49 = vpack.c.bf16 %v1324_v48, %v1323_v46 }
 0xeb3   :  { %v326_v51 = vpop.permute.xlu1 %325 }
 0xeb4   :  { %v349_v53 = vmul.f32 %v2661_v47, %v326_v51 }
 0xeb6   :  { %v469_v54 = vadd.f32 %v2672_v59, %v349_v53 }
 0xeb8   :  { %v494_v55 = vadd.f32 %v2664_v52, %v469_v54 }
 0xf17   :  { %v1021_v50 = vpop.permute.xlu0 %1020 }
 0xf18   :  { %1975 = vmatmul.mubr.msk.f32.vlgmr.msra.gmra.mrb[12].mxu1 %vm510_vm4, %v1021_v50 }
 0xf19   :  { %2096 = vmatpush3.bf16.msra.mxu1 %v2597_v7  ;;  %1996 = vmatprep.mubr.msk.f32.mxu1 %vm2403_vm2, %v2404_v18 }
 0xf1a   :  { %2097 = vmatprep.subr.bf16.mxu1 %v2402_v6 }
 0xf1d   :  { %2099 = vmatpush3.bf16.msra.mxu1 %v2617_v13 }
 0xf1e   :  { %2100 = vmatprep.subr.bf16.mxu1 %v2402_v6 }
 0xfeb   :  { %v1090_v56 = vpop.f32.mrb[12].mxu1 }
 0xfec   :  { %v1094_v58 = vadd.f32 %v1090_v56, %v494_v55  ;;  %v1976_v63 = vpop.f32.mrb[13].mxu1  ;;  %v1411_v55 = vld [vmem:[%s2894_s12] sm:$0xff]  ;;  %v1412_v56 = vld [vmem:[%s2894_s12 + $0x8] sm:$0xff] }
 0xfed   :  { %v1413_v63 = vld [vmem:[%s2894_s12 + $0x10] sm:$0xff] }
 0xfee   :  { %2200 = vtanh.f32 %v1094_v58  ;;  %v1787_v0 = vmul.f32 -1.442695, %v1094_v58  ;;  %v2104_v58 = vpack.c.bf16 %v1412_v56, %v1411_v55 }
 0xff0   :  { %2202 = vpow2.f32 %v1787_v0  ;;  %v1407_v0 = vld [vmem:[%s2893_s11] sm:$0xff] }
 0xff8   :  { %v2201_v7 = vpop.eup %2200 }
 0xff9   :  { %1104 = vrot.lane.b32.xlu0 %v2201_v7, %s2406_s4  ;;  %v1414_v7 = vld [vmem:[%s2894_s12 + $0x18] sm:$0xff] }
 0xffa   :  { %v2203_v1 = vpop.eup %2202 }
 0xffb   :  { %v1098_v13 = vadd.f32 1.0, %v2203_v1  ;;  %v1408_v1 = vld [vmem:[%s2893_s11 + $0x8] sm:$0xff] }
 0xffd   :  { %2204 = vrcp.f32 %v1098_v13  ;;  %v2107_v13 = vpack.c.bf16 %v1414_v7, %v1413_v63 }
0x1007   :  { %v2205_v2 = vpop.eup %2204 }
0x1008   :  { %v1102_v59 = vmul.f32 %v2205_v2, %v1010_v44 }
0x106b   :  { %v1105_v3 = vpop.permute.xlu0 %1104 }
0x106c   :  { %v1107_v4 = vmul.f32 %v2205_v2, %v1105_v3  ;;  %v1409_v3 = vld [vmem:[%s2893_s11 + $0x10] sm:$0xff] }
0x106e   :  { %1109 = vrot.lane.b32.xlu1 %v1107_v4, %s2406_s4  ;;  %v1410_v4 = vld [vmem:[%s2893_s11 + $0x18] sm:$0xff] }
0x10e0   :  { %v1110_v5 = vpop.permute.xlu1 %1109 }
0x10e1   :  { %v1112_v8 = vadd.f32 %v1110_v5, %v1102_v59  ;;  %v2113_v59 = vpack.c.bf16 %v1410_v4, %v1409_v3 }
0x10e3   :  { %2206 = vtanh.f32 %v1112_v8 }
0x10ed   :  { %v2207_v9 = vpop.eup %2206 }
0x10ee   :  { %1115 = vrot.lane.b32.xlu0 %v2207_v9, %s2406_s4 }
0x10f2   :  { %330 = vperm.xlu0 %2142, %v143_v10  }
0x1160   :  { %v1116_v11 = vpop.permute.xlu0 %1115 }
0x1161   :  { %v1118_v12 = vmul.f32 %v2205_v2, %v1116_v11  ;;  %v2110_v2 = vpack.c.bf16 %v1408_v1, %v1407_v0 }
0x1163   :  { %1122 = vrot.lane.b32.xlu1 %v1118_v12, %s2407_s2  ;;  %v1582_v12 = vld [vmem:[%s2897_s15] sm:$0xff] }
0x1171   :  { %v331_v15 = vpop.permute.xlu0 %330 }
0x1172   :  { %v350_v16 = vmul.f32 %v2661_v47, %v331_v15 }
0x1174   :  { %v474_v17 = vadd.f32 %v2678_v62, %v350_v16  ;;  %v1584_v16 = vld [vmem:[%s2897_s15 + $0x10] sm:$0xff] }
0x1176   :  { %v495_v19 = vadd.f32 %v2664_v52, %v474_v17  ;;  %v1585_v17 = vld [vmem:[%s2897_s15 + $0x18] sm:$0xff] }
0x11d5   :  { %v1123_v14 = vpop.permute.xlu1 %1122 }
0x11d6   :  { %1986 = vmatmul.mubr.msk.f32.vlgmr.msra.gmra.mrb[14].mxu0 %vm510_vm4, %v1123_v14  ;;  %v1583_v14 = vld [vmem:[%s2897_s15 + $0x8] sm:$0xff] }
0x11d7   :  { %2025 = vmatprep.mubr.msk.f32.mxu0 %vm2403_vm2, %v2404_v18  ;;  %2111 = vmatpush3.bf16.msra.mxu0 %v2110_v2  ;;  %v2116_v15 = vpack.c.bf16 %v1583_v14, %v1582_v12 }
0x11d8   :  { %2112 = vmatprep.subr.bf16.mxu0 %v2402_v6 }
0x11db   :  { %2114 = vmatpush3.bf16.msra.mxu0 %v2113_v59 }
0x11dc   :  { %2121 = vmatprep.subr.bf16.mxu0 %v2402_v6 }
0x12a9   :  { %v1192_v20 = vpop.f32.mrb[14].mxu0 }
0x12aa   :  { %v1196_v21 = vadd.f32 %v1192_v20, %v495_v19  ;;  %v1987_v57 = vpop.f32.mrb[15].mxu0  ;;  %v2119_v20 = vpack.c.bf16 %v1585_v17, %v1584_v16 }
0x12ac   :  { %2208 = vtanh.f32 %v1196_v21  ;;  %v1789_v23 = vmul.f32 -1.442695, %v1196_v21 }
0x12ae   :  { %2210 = vpow2.f32 %v1789_v23 }
0x12b6   :  { %v2209_v22 = vpop.eup %2208 }
0x12b7   :  { %1206 = vrot.lane.b32.xlu1 %v2209_v22, %s2406_s4 }
0x12b8   :  { %v2211_v24 = vpop.eup %2210 }
0x12b9   :  { %v1200_v25 = vadd.f32 1.0, %v2211_v24 }
0x12bb   :  { %2212 = vrcp.f32 %v1200_v25 }
0x12c5   :  { %v2213_v26 = vpop.eup %2212 }
0x12c6   :  { %v1204_v62 = vmul.f32 %v2213_v26, %v1112_v8  ;;  %v1792_v8 = vld [vmem:[%s2888_s6] ss:$0 sm:$0xff] }
0x1329   :  { %v1207_v27 = vpop.permute.xlu1 %1206 }
0x132a   :  { %v1209_v28 = vmul.f32 %v2213_v26, %v1207_v27  ;;  %v1577_v27 = vld [vmem:[%s2896_s14] sm:$0xff] }
0x132c   :  { %1211 = vrot.lane.b32.xlu0 %v1209_v28, %s2406_s4  ;;  %v1578_v28 = vld [vmem:[%s2896_s14 + $0x8] sm:$0xff] }
0x139e   :  { %v1212_v29 = vpop.permute.xlu0 %1211 }
0x139f   :  { %v1214_v30 = vadd.f32 %v1212_v29, %v1204_v62  ;;  %v2122_v62 = vpack.c.bf16 %v1578_v28, %v1577_v27  ;;  %v1579_v29 = vld [vmem:[%s2896_s14 + $0x10] sm:$0xff] }
0x13a1   :  { %2214 = vtanh.f32 %v1214_v30 }
0x13ab   :  { %v2215_v31 = vpop.eup %2214 }
0x13ac   :  { %1217 = vrot.lane.b32.xlu1 %v2215_v31, %s2406_s4 }
0x13b0   :  { %335 = vperm.xlu1 %2143, %v144_v32   ;;  %v1581_v32 = vld [vmem:[%s2896_s14 + $0x20] sm:$0xff] }
0x141e   :  { %v1218_v33 = vpop.permute.xlu1 %1217 }
0x141f   :  { %v1220_v34 = vmul.f32 %v2213_v26, %v1218_v33 }
0x1421   :  { %1224 = vrot.lane.b32.xlu0 %v1220_v34, %s2407_s2  ;;  %v1796_v34 = vld [vmem:[%s2895_s13] ss:$0 sm:$0xff]  ;;  %s2362_s13 = scalar_lea.vmem %s1746_s7, 128 }
0x1422   :  { %p2363_p6 = scmp.ne.s32.totalorder %s1746_s7, %s2362_s13  ;;  %p2368_p8 = scmp.lt.s32.totalorder %s2362_s13, %s2362_s13 }
0x1424   :  { %p2369_p9 = por %p2368_p8, %p2367_p7 }
0x1426   :  { %p2370_p10 = pnand %p2369_p9, %p2363_p6 }
0x142f   :  { %v336_v36 = vpop.permute.xlu1 %335 }
0x1430   :  { %v351_v37 = vmul.f32 %v2661_v47, %v336_v36  ;;  %v145_v47 = vld [vmem:[#allocation3] sm:$0xff] }
0x1432   :  { %v479_v38 = vadd.f32 %v2676_v61, %v351_v37 }
0x1434   :  { %v496_v39 = vadd.f32 %v2664_v52, %v479_v38 }
0x1493   :  { %v1225_v35 = vpop.permute.xlu0 %1224 }
0x1494   :  { %1997 = vmatmul.mubr.msk.f32.vlgmr.msra.gmra.mrb[14].mxu1 %vm510_vm4, %v1225_v35 }
0x1495   :  { %2003 = vmatprep.mubr.msk.f32.mxu1 %vm2403_vm2, %v2404_v18  ;;  %2102 = vmatpush3.bf16.msra.mxu1 %v2101_v49 }
0x1496   :  { %2103 = vmatprep.subr.bf16.mxu1 %v2402_v6 }
0x1498   :  { %2004 = vmatmul.mubr.msk.f32.vlgmr.msra.gmra.mrb[16].mxu1 %vm1332_vm5, %v145_v47 }
0x1499   :  { %2014 = vmatprep.mubr.msk.f32.mxu1 %vm2403_vm2, %v2404_v18  ;;  %2105 = vmatpush3.bf16.msra.mxu1 %v2104_v58 }
0x149a   :  { %2106 = vmatprep.subr.bf16.mxu1 %v2402_v6 }
0x149d   :  { %2108 = vmatpush3.bf16.msra.mxu1 %v2107_v13 }
0x149e   :  { %2115 = vmatprep.subr.bf16.mxu1 %v2402_v6 }
0x1567   :  { %v1294_v40 = vpop.f32.mrb[14].mxu1 }
0x1568   :  { %v1298_v41 = vadd.f32 %v1294_v40, %v496_v39  ;;  %v1998_v42 = vpop.f32.mrb[15].mxu1 }
0x156a   :  { %2216 = vtanh.f32 %v1298_v41  ;;  %v1791_v43 = vmul.f32 -1.442695, %v1298_v41  ;;  %v1800_v41 = vld [vmem:[%s2898_s16] ss:$0 sm:$0xff] }
0x156b   :  { %v1402_v9 = vpop.f32.mrb[16].mxu1 }
0x156c   :  { %2218 = vpow2.f32 %v1791_v43  ;;  %v1403_v10 = vadd.f32 %v1792_v8, %v1402_v9  ;;  %v2005_v11 = vpop.f32.mrb[17].mxu1 }
0x1574   :  { %v2217_v60 = vpop.eup %2216 }
0x1575   :  { %1308 = vrot.lane.b32.xlu0 %v2217_v60, %s2406_s4 }
0x1576   :  { %v2219_v44 = vpop.eup %2218 }
0x1577   :  { %v1302_v45 = vadd.f32 1.0, %v2219_v44 }
0x1579   :  { %2220 = vrcp.f32 %v1302_v45 }
0x1583   :  { %v2221_v52 = vpop.eup %2220 }
0x1584   :  { %v1306_v51 = vmul.f32 %v2221_v52, %v1214_v30  ;;  %v1580_v30 = vld [vmem:[%s2896_s14 + $0x18] sm:$0xff] }
0x1585   :  { %v2125_v31 = vpack.c.bf16 %v1580_v30, %v1579_v29 }
0x15e7   :  { %v1309_v61 = vpop.permute.xlu0 %1308 }
0x15e8   :  { %v1311_v50 = vmul.f32 %v2221_v52, %v1309_v61 }
0x15ea   :  { %1313 = vrot.lane.b32.xlu1 %v1311_v50, %s2406_s4 }
0x165c   :  { %v1314_v53 = vpop.permute.xlu1 %1313 }
0x165d   :  { %v1316_v54 = vadd.f32 %v1314_v53, %v1306_v51 }
0x165f   :  { %2222 = vtanh.f32 %v1316_v54 }
0x1660   :  { %2224 = vtanh.f32 %v1403_v10 }
0x1669   :  { %v2223_v5 = vpop.eup %2222 }
0x166a   :  { %1319 = vrot.lane.b32.xlu0 %v2223_v5, %s2406_s4  ;;  %v2225_v19 = vpop.eup %2224 }
0x166b   :  { %2015 = vmatmul.mubr.msk.f32.vlgmr.msra.gmra.mrb[18].mxu1 %vm510_vm4, %v2225_v19 }
0x166c   :  { %2117 = vmatpush3.bf16.msra.mxu1 %v2116_v15  ;;  %2036 = vmatprep.mubr.msk.f32.mxu1 %vm2403_vm2, %v2404_v18 }
0x166d   :  { %2118 = vmatprep.subr.bf16.mxu1 %v2402_v6 }
0x1670   :  { %2120 = vmatpush3.bf16.msra.mxu1 %v2119_v20 }
0x1673   :  { %2037 = vmatmul.mubr.msk.f32.vlgmr.msra.gmra.mrb[20].mxu1 %vm510_vm4, %v2225_v19 }
0x16dc   :  { %v1320_v21 = vpop.permute.xlu0 %1319 }
0x16dd   :  { %v1322_v57 = vmul.f32 %v2221_v52, %v1320_v21 }
0x16df   :  { %1489 = vrot.lane.b32.xlu1 %v1322_v57, %s2407_s2 }
0x173e   :  { %v1484_v23 = vpop.f32.mrb[18].mxu1 }
0x173f   :  { %v2016_v24 = vpop.f32.mrb[19].mxu1 }
0x1746   :  { %v1652_v25 = vpop.f32.mrb[20].mxu1 }
0x1747   :  { %v2038_v26 = vpop.f32.mrb[21].mxu1 }
0x1751   :  { %v1490_v22 = vpop.permute.xlu1 %1489 }
0x1752   :  { %2026 = vmatmul.mubr.msk.f32.vlgmr.msra.gmra.mrb[16].mxu0 %vm510_vm4, %v1490_v22 }
0x1753   :  { %2049 = vmatprep.mubr.msk.f32.mxu0 %vm2403_vm2, %v2404_v18  ;;  %2123 = vmatpush3.bf16.msra.mxu0 %v2122_v62 }
0x1754   :  { %2124 = vmatprep.subr.bf16.mxu0 %v2402_v6 }
0x1757   :  { %2126 = vmatpush3.bf16.msra.mxu0 %v2125_v31 }
0x1758   :  { %2047 = vmatprep.subr.mxu0 %v2404_v18 }
0x175b   :  { %2048 = vmatpush3.msra.mxu0 %v1581_v32 }
0x1825   :  { %v1559_v33 = vpop.f32.mrb[16].mxu0 }
0x1826   :  { %v1560_v35 = vadd.f32 %v1559_v33, %v1484_v23  ;;  %v2027_v36 = vpop.f32.mrb[17].mxu0 }
0x1828   :  { %v1570_v37 = vadd.f32 %v1796_v34, %v1560_v35 }
0x182a   :  { %v1797_v38 = vmul.f32 -1.442695, %v1570_v37 }
0x182c   :  { %2226 = vpow2.f32 %v1797_v38 }
0x1836   :  { %v2227_v39 = vpop.eup %2226 }
0x1837   :  { %v1574_v6 = vadd.f32 1.0, %v2227_v39 }
0x1839   :  { %2228 = vrcp.f32 %v1574_v6 }
0x1843   :  { %v2229_v18 = vpop.eup %2228 }
0x1844   :  { %2050 = vmatmul.mubr.msk.f32.vlgmr.msra.gmra.mrb[18].mxu0 %vm1656_vm6, %v2229_v18 }
0x1917   :  { %v1726_v40 = vpop.f32.mrb[18].mxu0 }
0x1918   :  { %v1727_v42 = vadd.f32 %v1726_v40, %v1652_v25  ;;  %v2051_v60 = vpop.f32.mrb[19].mxu0 }
0x191a   :  { %v1737_v43 = vadd.f32 %v1800_v41, %v1727_v42 }
0x191c   :  { %1738 = vst [vmem:[#allocation14] sm:$0xff] %v1737_v43 }
0x191d   :  { %2373 = shalt.err (!%p2370_p10)
}
0x191e   :  { %s2374_s12 = scalar_lea.hbm %s2899_s17, 128 }
0x191f   :  { %p2375_p11 = scmp.ne.s32.totalorder %s2899_s17, %s2374_s12  ;;  %p2378_p12 = scmp.lt.u32.totalorder %s2374_s12, %s2899_s17 }
0x1921   :  { %p2380_p13 = pnand %p2378_p12, %p2375_p11 }
0x1923   :  { %2383 = shalt.err (!%p2380_p13)
}
0x1924   :  { %1748 = dma.vmem_to_hbm [thread:$0]  %s1746_s7, 128, %s2899_s17, [#allocation5]  }
0x1925   :  { %2392 = dma.done.wait [#allocation5], 128  }
0x1926   :  { %2393 = vsyncadd [#allocation5], 4294967168 }
0x1927   :  { %1752 = vsyncpa [#allocation4], 1 }
0x1928   :  { %1753 = vsyncpa [#allocation7], 1 }
0x1929   :  { %1754 = vsyncpa [#allocation10], 1 }
0x192a   :  { %1755 = vsyncpa [#allocation13], 1 }
0x192b   :  { %1756 = vsyncpa [#allocation5], 1 }

</bundles_post_ra>
